<compile_context>
chip_gen: v5e
topology: v5e:2x2
jax: 0.10.0
libtpu: 0.0.40
codegen_flags: <defaults>
</compile_context>

<pallas_src>
import functools

import jax
import jax.numpy as jnp
import numpy as np
from jax import lax
from jax.experimental import pallas as pl
from jax.experimental.pallas import tpu as pltpu


def bilstm_kernel(zx_ref, whh_ref, wfc_ref, bfc_ref, out_ref, *,
                  seq_len, batch_p, hidden_dim):
    T, Bp, H = seq_len, batch_p, hidden_dim
    H2, H4, H6 = 2 * H, 4 * H, 6 * H

    # ---- serial recurrence, fwd/bwd fused along the lane axis ----
    # State h, c are (Bp, 2H) = [h_f | h_b]; W_hh is block-diagonal (2H, 8H) so each
    # step is one MXU push + one sigmoid pass over 6H lanes + one tanh pass over 2H.
    def step(t, carry):
        h, c = carry
        z = zx_ref[t] + jnp.dot(h, whh_ref[...],
                                preferred_element_type=jnp.float32)   # (Bp, 8H)
        sg = jax.nn.sigmoid(z[:, :H6])          # gates i, f, o  (each 2H wide)
        g = jnp.tanh(z[:, H6:])                 # gate g         (2H wide)
        i = sg[:, 0:H2]
        f = sg[:, H2:H4]
        o = sg[:, H4:H6]
        c_new = f * c + i * g
        h_new = o * jnp.tanh(c_new)
        return h_new, c_new

    h0 = jnp.zeros((Bp, H2), jnp.float32)
    c0 = jnp.zeros((Bp, H2), jnp.float32)
    h_fin, _ = lax.fori_loop(0, T, step, (h0, c0),
                             unroll=(T if T <= 8 else 8))

    # ---- fc(h_f + h_b) + log_softmax on a lane-dense padded tile ----
    # wfc_ref is [w_fc; w_fc] (2H, CP) zero-padded in lanes; bfc padded with -1e30
    # so padded lanes never win the max / contribute to the sum.
    logits = (jnp.dot(h_fin, wfc_ref[...], preferred_element_type=jnp.float32)
              + bfc_ref[...])
    m = jnp.max(logits, axis=1, keepdims=True)
    lse = jnp.log(jnp.sum(jnp.exp(logits - m), axis=1, keepdims=True)) + m
    out_ref[...] = logits - lse


def _pack_params(params, class_num):
    """One-time (trace-time) weight repacking: gate-major, fwd/bwd interleaved."""
    H = params["hidden_dim"]
    C = class_num
    CP = ((C + 127) // 128) * 128          # lane-dense padded class dim

    # Raw params use PyTorch gate order (i, f, g, o) along the 4H axis.
    def gates(w):
        return {"i": w[..., 0 * H:1 * H], "f": w[..., 1 * H:2 * H],
                "g": w[..., 2 * H:3 * H], "o": w[..., 3 * H:4 * H]}

    order = ("i", "f", "o", "g")           # sigmoid gates first, tanh gate last

    gih_f, gih_b = gates(params["w_ih_f"]), gates(params["w_ih_b"])
    ghh_f, ghh_b = gates(params["w_hh_f"]), gates(params["w_hh_b"])
    gb_f, gb_b = gates(params["b_f"]), gates(params["b_b"])

    # Per-direction gate-major input projection weights / biases (for the tables).
    w_ih_f = jnp.concatenate([gih_f[k] for k in order], axis=1)    # (E, 4H)
    w_ih_b = jnp.concatenate([gih_b[k] for k in order], axis=1)    # (E, 4H)
    b_f = jnp.concatenate([gb_f[k] for k in order], axis=1)        # (1, 4H)
    b_b = jnp.concatenate([gb_b[k] for k in order], axis=1)        # (1, 4H)

    # Block-diagonal hidden weights: rows = [h_f | h_b], columns per gate k are
    # [k_f (from w_hh_f) | k_b (from w_hh_b)], giving (2H, 8H).
    zH = jnp.zeros((H, H), jnp.float32)
    blocks = []
    for k in order:
        blocks.append(jnp.concatenate([ghh_f[k], zH], axis=0))     # column k_f
        blocks.append(jnp.concatenate([zH, ghh_b[k]], axis=0))     # column k_b
    w_hh = jnp.concatenate(blocks, axis=1)                         # (2H, 8H)

    w_fc2 = jnp.concatenate([params["w_fc"], params["w_fc"]], axis=0)   # (2H, C)
    w_fc = jnp.pad(w_fc2, ((0, 0), (0, CP - C)))                        # (2H, CP)
    b_fc = jnp.pad(params["b_fc"], ((0, 0), (0, CP - C)),
                   constant_values=-1e30)                               # (1, CP)
    return w_ih_f, w_ih_b, b_f, b_b, w_hh, w_fc, b_fc, CP


def model_forward(seq, params, class_num):
    B, T = seq.shape
    H = params["hidden_dim"]
    C = class_num

    w_ih_f, w_ih_b, b_f, b_b, w_hh, w_fc, b_fc, CP = _pack_params(params, C)

    # Trace-time (V, 4H) projection tables per direction (V is tiny vs T*B):
    emb = params["embedding"].astype(jnp.float32)
    table_f = emb @ w_ih_f + b_f            # (V, 4H) gate-major fwd
    table_b = emb @ w_ih_b + b_b            # (V, 4H) gate-major bwd

    # Gather time-major (fwd) and time-reversed (bwd), interleave per gate block:
    # zx[t, b] = [i_f(x_t) i_b(x_{T-1-t}) f_f f_b o_f o_b g_f g_b]   -> (T, B, 8H)
    seq_t = seq.T                                              # (T, B)
    zx_f = table_f[seq_t].reshape(T, B, 4, H)                  # gates of x[t]
    zx_b = table_b[seq_t[::-1]].reshape(T, B, 4, H)            # gates of x[T-1-t]
    zx = jnp.stack([zx_f, zx_b], axis=3).reshape(T, B, 8 * H)

    # Pad batch to a multiple of 8 sublanes (full-vreg ops, unmasked stores).
    Bp = ((B + 7) // 8) * 8
    if Bp != B:
        zx = jnp.pad(zx, ((0, 0), (0, Bp - B), (0, 0)))

    kernel = functools.partial(bilstm_kernel, seq_len=T, batch_p=Bp, hidden_dim=H)

    grid_spec = pltpu.PrefetchScalarGridSpec(
        num_scalar_prefetch=0,
        grid=(1,),
        in_specs=[
            pl.BlockSpec((T, Bp, 8 * H), lambda i: (0, 0, 0)),
            pl.BlockSpec((2 * H, 8 * H), lambda i: (0, 0)),
            pl.BlockSpec((2 * H, CP), lambda i: (0, 0)),
            pl.BlockSpec((1, CP), lambda i: (0, 0)),
        ],
        out_specs=pl.BlockSpec((Bp, CP), lambda i: (0, 0)),
    )

    out_pad = pl.pallas_call(
        kernel,
        out_shape=jax.ShapeDtypeStruct((Bp, CP), jnp.float32),
        grid_spec=grid_spec,
        compiler_params=pltpu.CompilerParams(
            dimension_semantics=("arbitrary",),
            vmem_limit_bytes=64 << 20),
    )(zx, w_hh, w_fc, b_fc)

    return out_pad[:B, :C]


# ---------------- pure-JAX reference for validation ----------------
def _ref_dir(x_bte, w_ih, w_hh, b, H, reverse):
    x = x_bte[:, ::-1, :] if reverse else x_bte
    B = x.shape[0]

    def step(carry, xt):
        h, c = carry
        z = xt @ w_ih + h @ w_hh + b
        i = jax.nn.sigmoid(z[:, :H])
        f = jax.nn.sigmoid(z[:, H:2 * H])
        g = jnp.tanh(z[:, 2 * H:3 * H])
        o = jax.nn.sigmoid(z[:, 3 * H:])
        c = f * c + i * g
        h = o * jnp.tanh(c)
        return (h, c), None

    init = (jnp.zeros((B, H), jnp.float32), jnp.zeros((B, H), jnp.float32))
    (h, _), _ = jax.lax.scan(step, init, jnp.transpose(x, (1, 0, 2)))
    return h


def model_forward_ref(seq, params, class_num):
    H = params["hidden_dim"]
    emb = params["embedding"][seq]
    hf = _ref_dir(emb, params["w_ih_f"], params["w_hh_f"], params["b_f"], H, False)
    hb = _ref_dir(emb, params["w_ih_b"], params["w_hh_b"], params["b_b"], H, True)
    logits = (hf + hb) @ params["w_fc"] + params["b_fc"]
    return jax.nn.log_softmax(logits, axis=1)


if __name__ == "__main__":
    # small shapes consistent with the module
    V, E, T, B, H, C = 50, 16, 8, 2, 32, 4

    key = jax.random.PRNGKey(0)
    ks = jax.random.split(key, 12)
    k = 1.0 / np.sqrt(H)

    params = {
        "hidden_dim": H,
        # nn.Embedding default init: N(0, 1)
        "embedding": jax.random.normal(ks[0], (V, E), jnp.float32),
        # nn.LSTM params U(-1/sqrt(H), 1/sqrt(H)); stored pre-transposed,
        # combined bias = b_ih + b_hh
        "w_ih_f": jax.random.uniform(ks[1], (E, 4 * H), jnp.float32, -k, k),
        "w_hh_f": jax.random.uniform(ks[2], (H, 4 * H), jnp.float32, -k, k),
        "b_f":    jax.random.uniform(ks[3], (1, 4 * H), jnp.float32, -k, k)
                + jax.random.uniform(ks[4], (1, 4 * H), jnp.float32, -k, k),
        "w_ih_b": jax.random.uniform(ks[5], (E, 4 * H), jnp.float32, -k, k),
        "w_hh_b": jax.random.uniform(ks[6], (H, 4 * H), jnp.float32, -k, k),
        "b_b":    jax.random.uniform(ks[7], (1, 4 * H), jnp.float32, -k, k)
                + jax.random.uniform(ks[8], (1, 4 * H), jnp.float32, -k, k),
        # nn.Linear(H, C): U(-1/sqrt(H), 1/sqrt(H))
        "w_fc":   jax.random.uniform(ks[9], (H, C), jnp.float32, -k, k),
        "b_fc":   jax.random.uniform(ks[10], (1, C), jnp.float32, -k, k),
    }

    seq = jax.random.randint(ks[11], (B, T), 0, V, dtype=jnp.int32)

    out = model_forward(seq, params, C)
    out = jax.block_until_ready(out)

    ref = jax.block_until_ready(model_forward_ref(seq, params, C))
    np.testing.assert_allclose(np.asarray(out), np.asarray(ref),
                               rtol=5e-4, atol=5e-4)
    assert out.shape == (B, C)

    print("KERNEL_OK")
</pallas_src>

<mosaic_0001>
module attributes {stable_mosaic.version = 11 : i64} {
  func.func @bilstm_kernel(%arg0: i32, %arg1: memref<8x8x256xf32, #tpu.memory_space<vmem>>, %arg2: memref<64x256xf32, #tpu.memory_space<vmem>>, %arg3: memref<64x128xf32, #tpu.memory_space<vmem>>, %arg4: memref<1x128xf32, #tpu.memory_space<vmem>>, %arg5: memref<8x128xf32, #tpu.memory_space<vmem>>) attributes {dimension_semantics = [#tpu.dimension_semantics<arbitrary>], iteration_bounds = array<i64: 1>, scalar_prefetch = 0 : i64, scratch_operands = 0 : i64, tpu.core_type = #tpu.core_type<tc>, window_params = [{pipeline_mode = #tpu.pipeline_mode<synchronous>, transform_indices = @transform_0, window_bounds = array<i64: 8, 8, 256>}, {pipeline_mode = #tpu.pipeline_mode<synchronous>, transform_indices = @transform_1, window_bounds = array<i64: 64, 256>}, {pipeline_mode = #tpu.pipeline_mode<synchronous>, transform_indices = @transform_2, window_bounds = array<i64: 64, 128>}, {pipeline_mode = #tpu.pipeline_mode<synchronous>, transform_indices = @transform_3, window_bounds = array<i64: 1, 128>}, {pipeline_mode = #tpu.pipeline_mode<synchronous>, transform_indices = @transform_4, window_bounds = array<i64: 8, 128>}]} {
    %cst = arith.constant 0.000000e+00 : f32
    %0 = vector.broadcast %cst : f32 to vector<8x64xf32>
    %cst_0 = arith.constant 0.000000e+00 : f32
    %1 = vector.broadcast %cst_0 : f32 to vector<8x64xf32>
    %c0_i32 = arith.constant 0 : i32
    %2 = arith.index_cast %c0_i32 : i32 to index
    %c0 = arith.constant 0 : index
    %c0_1 = arith.constant 0 : index
    %3 = vector.load %arg1[%2, %c0, %c0_1] : memref<8x8x256xf32, #tpu.memory_space<vmem>>, vector<1x8x256xf32>
    %4 = vector.shape_cast %3 : vector<1x8x256xf32> to vector<8x256xf32>
    %c0_2 = arith.constant 0 : index
    %c0_3 = arith.constant 0 : index
    %5 = vector.load %arg2[%c0_2, %c0_3] : memref<64x256xf32, #tpu.memory_space<vmem>>, vector<64x256xf32>
    %cst_4 = arith.constant dense<0.000000e+00> : vector<8x256xf32>
    %6 = tpu.matmul %0, %5, %cst_4 {dimension_numbers = #tpu.dot_dimension_numbers<[1], [0], [0], [1], [0, 0, 1, 1], [], []>} : vector<8x64xf32>, vector<64x256xf32>, vector<8x256xf32> -> vector<8x256xf32>
    %7 = arith.addf %4, %6 : vector<8x256xf32>
    %8 = vector.extract_strided_slice %7 {offsets = [0, 0], sizes = [8, 192], strides = [1, 1]} : vector<8x256xf32> to vector<8x192xf32>
    %9 = arith.negf %8 : vector<8x192xf32>
    %10 = math.exp %9 : vector<8x192xf32>
    %cst_5 = arith.constant 1.000000e+00 : f32
    %11 = vector.broadcast %cst_5 : f32 to vector<8x192xf32>
    %12 = arith.addf %11, %10 : vector<8x192xf32>
    %13 = arith.divf %11, %12 : vector<8x192xf32>
    %14 = vector.extract_strided_slice %7 {offsets = [0, 192], sizes = [8, 64], strides = [1, 1]} : vector<8x256xf32> to vector<8x64xf32>
    %15 = math.tanh %14 : vector<8x64xf32>
    %16 = vector.extract_strided_slice %13 {offsets = [0, 0], sizes = [8, 64], strides = [1, 1]} : vector<8x192xf32> to vector<8x64xf32>
    %17 = vector.extract_strided_slice %13 {offsets = [0, 64], sizes = [8, 64], strides = [1, 1]} : vector<8x192xf32> to vector<8x64xf32>
    %18 = vector.extract_strided_slice %13 {offsets = [0, 128], sizes = [8, 64], strides = [1, 1]} : vector<8x192xf32> to vector<8x64xf32>
    %19 = arith.mulf %17, %1 : vector<8x64xf32>
    %20 = arith.mulf %16, %15 : vector<8x64xf32>
    %21 = arith.addf %19, %20 : vector<8x64xf32>
    %22 = math.tanh %21 : vector<8x64xf32>
    %23 = arith.mulf %18, %22 : vector<8x64xf32>
    %c1_i32 = arith.constant 1 : i32
    %24 = arith.index_cast %c1_i32 : i32 to index
    %c0_6 = arith.constant 0 : index
    %c0_7 = arith.constant 0 : index
    %25 = vector.load %arg1[%24, %c0_6, %c0_7] : memref<8x8x256xf32, #tpu.memory_space<vmem>>, vector<1x8x256xf32>
    %26 = vector.shape_cast %25 : vector<1x8x256xf32> to vector<8x256xf32>
    %c0_8 = arith.constant 0 : index
    %c0_9 = arith.constant 0 : index
    %27 = vector.load %arg2[%c0_8, %c0_9] : memref<64x256xf32, #tpu.memory_space<vmem>>, vector<64x256xf32>
    %cst_10 = arith.constant dense<0.000000e+00> : vector<8x256xf32>
    %28 = tpu.matmul %23, %27, %cst_10 {dimension_numbers = #tpu.dot_dimension_numbers<[1], [0], [0], [1], [0, 0, 1, 1], [], []>} : vector<8x64xf32>, vector<64x256xf32>, vector<8x256xf32> -> vector<8x256xf32>
    %29 = arith.addf %26, %28 : vector<8x256xf32>
    %30 = vector.extract_strided_slice %29 {offsets = [0, 0], sizes = [8, 192], strides = [1, 1]} : vector<8x256xf32> to vector<8x192xf32>
    %31 = arith.negf %30 : vector<8x192xf32>
    %32 = math.exp %31 : vector<8x192xf32>
    %cst_11 = arith.constant 1.000000e+00 : f32
    %33 = vector.broadcast %cst_11 : f32 to vector<8x192xf32>
    %34 = arith.addf %33, %32 : vector<8x192xf32>
    %35 = arith.divf %33, %34 : vector<8x192xf32>
    %36 = vector.extract_strided_slice %29 {offsets = [0, 192], sizes = [8, 64], strides = [1, 1]} : vector<8x256xf32> to vector<8x64xf32>
    %37 = math.tanh %36 : vector<8x64xf32>
    %38 = vector.extract_strided_slice %35 {offsets = [0, 0], sizes = [8, 64], strides = [1, 1]} : vector<8x192xf32> to vector<8x64xf32>
    %39 = vector.extract_strided_slice %35 {offsets = [0, 64], sizes = [8, 64], strides = [1, 1]} : vector<8x192xf32> to vector<8x64xf32>
    %40 = vector.extract_strided_slice %35 {offsets = [0, 128], sizes = [8, 64], strides = [1, 1]} : vector<8x192xf32> to vector<8x64xf32>
    %41 = arith.mulf %39, %21 : vector<8x64xf32>
    %42 = arith.mulf %38, %37 : vector<8x64xf32>
    %43 = arith.addf %41, %42 : vector<8x64xf32>
    %44 = math.tanh %43 : vector<8x64xf32>
    %45 = arith.mulf %40, %44 : vector<8x64xf32>
    %c2_i32 = arith.constant 2 : i32
    %46 = arith.index_cast %c2_i32 : i32 to index
    %c0_12 = arith.constant 0 : index
    %c0_13 = arith.constant 0 : index
    %47 = vector.load %arg1[%46, %c0_12, %c0_13] : memref<8x8x256xf32, #tpu.memory_space<vmem>>, vector<1x8x256xf32>
    %48 = vector.shape_cast %47 : vector<1x8x256xf32> to vector<8x256xf32>
    %c0_14 = arith.constant 0 : index
    %c0_15 = arith.constant 0 : index
    %49 = vector.load %arg2[%c0_14, %c0_15] : memref<64x256xf32, #tpu.memory_space<vmem>>, vector<64x256xf32>
    %cst_16 = arith.constant dense<0.000000e+00> : vector<8x256xf32>
    %50 = tpu.matmul %45, %49, %cst_16 {dimension_numbers = #tpu.dot_dimension_numbers<[1], [0], [0], [1], [0, 0, 1, 1], [], []>} : vector<8x64xf32>, vector<64x256xf32>, vector<8x256xf32> -> vector<8x256xf32>
    %51 = arith.addf %48, %50 : vector<8x256xf32>
    %52 = vector.extract_strided_slice %51 {offsets = [0, 0], sizes = [8, 192], strides = [1, 1]} : vector<8x256xf32> to vector<8x192xf32>
    %53 = arith.negf %52 : vector<8x192xf32>
    %54 = math.exp %53 : vector<8x192xf32>
    %cst_17 = arith.constant 1.000000e+00 : f32
    %55 = vector.broadcast %cst_17 : f32 to vector<8x192xf32>
    %56 = arith.addf %55, %54 : vector<8x192xf32>
    %57 = arith.divf %55, %56 : vector<8x192xf32>
    %58 = vector.extract_strided_slice %51 {offsets = [0, 192], sizes = [8, 64], strides = [1, 1]} : vector<8x256xf32> to vector<8x64xf32>
    %59 = math.tanh %58 : vector<8x64xf32>
    %60 = vector.extract_strided_slice %57 {offsets = [0, 0], sizes = [8, 64], strides = [1, 1]} : vector<8x192xf32> to vector<8x64xf32>
    %61 = vector.extract_strided_slice %57 {offsets = [0, 64], sizes = [8, 64], strides = [1, 1]} : vector<8x192xf32> to vector<8x64xf32>
    %62 = vector.extract_strided_slice %57 {offsets = [0, 128], sizes = [8, 64], strides = [1, 1]} : vector<8x192xf32> to vector<8x64xf32>
    %63 = arith.mulf %61, %43 : vector<8x64xf32>
    %64 = arith.mulf %60, %59 : vector<8x64xf32>
    %65 = arith.addf %63, %64 : vector<8x64xf32>
    %66 = math.tanh %65 : vector<8x64xf32>
    %67 = arith.mulf %62, %66 : vector<8x64xf32>
    %c3_i32 = arith.constant 3 : i32
    %68 = arith.index_cast %c3_i32 : i32 to index
    %c0_18 = arith.constant 0 : index
    %c0_19 = arith.constant 0 : index
    %69 = vector.load %arg1[%68, %c0_18, %c0_19] : memref<8x8x256xf32, #tpu.memory_space<vmem>>, vector<1x8x256xf32>
    %70 = vector.shape_cast %69 : vector<1x8x256xf32> to vector<8x256xf32>
    %c0_20 = arith.constant 0 : index
    %c0_21 = arith.constant 0 : index
    %71 = vector.load %arg2[%c0_20, %c0_21] : memref<64x256xf32, #tpu.memory_space<vmem>>, vector<64x256xf32>
    %cst_22 = arith.constant dense<0.000000e+00> : vector<8x256xf32>
    %72 = tpu.matmul %67, %71, %cst_22 {dimension_numbers = #tpu.dot_dimension_numbers<[1], [0], [0], [1], [0, 0, 1, 1], [], []>} : vector<8x64xf32>, vector<64x256xf32>, vector<8x256xf32> -> vector<8x256xf32>
    %73 = arith.addf %70, %72 : vector<8x256xf32>
    %74 = vector.extract_strided_slice %73 {offsets = [0, 0], sizes = [8, 192], strides = [1, 1]} : vector<8x256xf32> to vector<8x192xf32>
    %75 = arith.negf %74 : vector<8x192xf32>
    %76 = math.exp %75 : vector<8x192xf32>
    %cst_23 = arith.constant 1.000000e+00 : f32
    %77 = vector.broadcast %cst_23 : f32 to vector<8x192xf32>
    %78 = arith.addf %77, %76 : vector<8x192xf32>
    %79 = arith.divf %77, %78 : vector<8x192xf32>
    %80 = vector.extract_strided_slice %73 {offsets = [0, 192], sizes = [8, 64], strides = [1, 1]} : vector<8x256xf32> to vector<8x64xf32>
    %81 = math.tanh %80 : vector<8x64xf32>
    %82 = vector.extract_strided_slice %79 {offsets = [0, 0], sizes = [8, 64], strides = [1, 1]} : vector<8x192xf32> to vector<8x64xf32>
    %83 = vector.extract_strided_slice %79 {offsets = [0, 64], sizes = [8, 64], strides = [1, 1]} : vector<8x192xf32> to vector<8x64xf32>
    %84 = vector.extract_strided_slice %79 {offsets = [0, 128], sizes = [8, 64], strides = [1, 1]} : vector<8x192xf32> to vector<8x64xf32>
    %85 = arith.mulf %83, %65 : vector<8x64xf32>
    %86 = arith.mulf %82, %81 : vector<8x64xf32>
    %87 = arith.addf %85, %86 : vector<8x64xf32>
    %88 = math.tanh %87 : vector<8x64xf32>
    %89 = arith.mulf %84, %88 : vector<8x64xf32>
    %c4_i32 = arith.constant 4 : i32
    %90 = arith.index_cast %c4_i32 : i32 to index
    %c0_24 = arith.constant 0 : index
    %c0_25 = arith.constant 0 : index
    %91 = vector.load %arg1[%90, %c0_24, %c0_25] : memref<8x8x256xf32, #tpu.memory_space<vmem>>, vector<1x8x256xf32>
    %92 = vector.shape_cast %91 : vector<1x8x256xf32> to vector<8x256xf32>
    %c0_26 = arith.constant 0 : index
    %c0_27 = arith.constant 0 : index
    %93 = vector.load %arg2[%c0_26, %c0_27] : memref<64x256xf32, #tpu.memory_space<vmem>>, vector<64x256xf32>
    %cst_28 = arith.constant dense<0.000000e+00> : vector<8x256xf32>
    %94 = tpu.matmul %89, %93, %cst_28 {dimension_numbers = #tpu.dot_dimension_numbers<[1], [0], [0], [1], [0, 0, 1, 1], [], []>} : vector<8x64xf32>, vector<64x256xf32>, vector<8x256xf32> -> vector<8x256xf32>
    %95 = arith.addf %92, %94 : vector<8x256xf32>
    %96 = vector.extract_strided_slice %95 {offsets = [0, 0], sizes = [8, 192], strides = [1, 1]} : vector<8x256xf32> to vector<8x192xf32>
    %97 = arith.negf %96 : vector<8x192xf32>
    %98 = math.exp %97 : vector<8x192xf32>
    %cst_29 = arith.constant 1.000000e+00 : f32
    %99 = vector.broadcast %cst_29 : f32 to vector<8x192xf32>
    %100 = arith.addf %99, %98 : vector<8x192xf32>
    %101 = arith.divf %99, %100 : vector<8x192xf32>
    %102 = vector.extract_strided_slice %95 {offsets = [0, 192], sizes = [8, 64], strides = [1, 1]} : vector<8x256xf32> to vector<8x64xf32>
    %103 = math.tanh %102 : vector<8x64xf32>
    %104 = vector.extract_strided_slice %101 {offsets = [0, 0], sizes = [8, 64], strides = [1, 1]} : vector<8x192xf32> to vector<8x64xf32>
    %105 = vector.extract_strided_slice %101 {offsets = [0, 64], sizes = [8, 64], strides = [1, 1]} : vector<8x192xf32> to vector<8x64xf32>
    %106 = vector.extract_strided_slice %101 {offsets = [0, 128], sizes = [8, 64], strides = [1, 1]} : vector<8x192xf32> to vector<8x64xf32>
    %107 = arith.mulf %105, %87 : vector<8x64xf32>
    %108 = arith.mulf %104, %103 : vector<8x64xf32>
    %109 = arith.addf %107, %108 : vector<8x64xf32>
    %110 = math.tanh %109 : vector<8x64xf32>
    %111 = arith.mulf %106, %110 : vector<8x64xf32>
    %c5_i32 = arith.constant 5 : i32
    %112 = arith.index_cast %c5_i32 : i32 to index
    %c0_30 = arith.constant 0 : index
    %c0_31 = arith.constant 0 : index
    %113 = vector.load %arg1[%112, %c0_30, %c0_31] : memref<8x8x256xf32, #tpu.memory_space<vmem>>, vector<1x8x256xf32>
    %114 = vector.shape_cast %113 : vector<1x8x256xf32> to vector<8x256xf32>
    %c0_32 = arith.constant 0 : index
    %c0_33 = arith.constant 0 : index
    %115 = vector.load %arg2[%c0_32, %c0_33] : memref<64x256xf32, #tpu.memory_space<vmem>>, vector<64x256xf32>
    %cst_34 = arith.constant dense<0.000000e+00> : vector<8x256xf32>
    %116 = tpu.matmul %111, %115, %cst_34 {dimension_numbers = #tpu.dot_dimension_numbers<[1], [0], [0], [1], [0, 0, 1, 1], [], []>} : vector<8x64xf32>, vector<64x256xf32>, vector<8x256xf32> -> vector<8x256xf32>
    %117 = arith.addf %114, %116 : vector<8x256xf32>
    %118 = vector.extract_strided_slice %117 {offsets = [0, 0], sizes = [8, 192], strides = [1, 1]} : vector<8x256xf32> to vector<8x192xf32>
    %119 = arith.negf %118 : vector<8x192xf32>
    %120 = math.exp %119 : vector<8x192xf32>
    %cst_35 = arith.constant 1.000000e+00 : f32
    %121 = vector.broadcast %cst_35 : f32 to vector<8x192xf32>
    %122 = arith.addf %121, %120 : vector<8x192xf32>
    %123 = arith.divf %121, %122 : vector<8x192xf32>
    %124 = vector.extract_strided_slice %117 {offsets = [0, 192], sizes = [8, 64], strides = [1, 1]} : vector<8x256xf32> to vector<8x64xf32>
    %125 = math.tanh %124 : vector<8x64xf32>
    %126 = vector.extract_strided_slice %123 {offsets = [0, 0], sizes = [8, 64], strides = [1, 1]} : vector<8x192xf32> to vector<8x64xf32>
    %127 = vector.extract_strided_slice %123 {offsets = [0, 64], sizes = [8, 64], strides = [1, 1]} : vector<8x192xf32> to vector<8x64xf32>
    %128 = vector.extract_strided_slice %123 {offsets = [0, 128], sizes = [8, 64], strides = [1, 1]} : vector<8x192xf32> to vector<8x64xf32>
    %129 = arith.mulf %127, %109 : vector<8x64xf32>
    %130 = arith.mulf %126, %125 : vector<8x64xf32>
    %131 = arith.addf %129, %130 : vector<8x64xf32>
    %132 = math.tanh %131 : vector<8x64xf32>
    %133 = arith.mulf %128, %132 : vector<8x64xf32>
    %c6_i32 = arith.constant 6 : i32
    %134 = arith.index_cast %c6_i32 : i32 to index
    %c0_36 = arith.constant 0 : index
    %c0_37 = arith.constant 0 : index
    %135 = vector.load %arg1[%134, %c0_36, %c0_37] : memref<8x8x256xf32, #tpu.memory_space<vmem>>, vector<1x8x256xf32>
    %136 = vector.shape_cast %135 : vector<1x8x256xf32> to vector<8x256xf32>
    %c0_38 = arith.constant 0 : index
    %c0_39 = arith.constant 0 : index
    %137 = vector.load %arg2[%c0_38, %c0_39] : memref<64x256xf32, #tpu.memory_space<vmem>>, vector<64x256xf32>
    %cst_40 = arith.constant dense<0.000000e+00> : vector<8x256xf32>
    %138 = tpu.matmul %133, %137, %cst_40 {dimension_numbers = #tpu.dot_dimension_numbers<[1], [0], [0], [1], [0, 0, 1, 1], [], []>} : vector<8x64xf32>, vector<64x256xf32>, vector<8x256xf32> -> vector<8x256xf32>
    %139 = arith.addf %136, %138 : vector<8x256xf32>
    %140 = vector.extract_strided_slice %139 {offsets = [0, 0], sizes = [8, 192], strides = [1, 1]} : vector<8x256xf32> to vector<8x192xf32>
    %141 = arith.negf %140 : vector<8x192xf32>
    %142 = math.exp %141 : vector<8x192xf32>
    %cst_41 = arith.constant 1.000000e+00 : f32
    %143 = vector.broadcast %cst_41 : f32 to vector<8x192xf32>
    %144 = arith.addf %143, %142 : vector<8x192xf32>
    %145 = arith.divf %143, %144 : vector<8x192xf32>
    %146 = vector.extract_strided_slice %139 {offsets = [0, 192], sizes = [8, 64], strides = [1, 1]} : vector<8x256xf32> to vector<8x64xf32>
    %147 = math.tanh %146 : vector<8x64xf32>
    %148 = vector.extract_strided_slice %145 {offsets = [0, 0], sizes = [8, 64], strides = [1, 1]} : vector<8x192xf32> to vector<8x64xf32>
    %149 = vector.extract_strided_slice %145 {offsets = [0, 64], sizes = [8, 64], strides = [1, 1]} : vector<8x192xf32> to vector<8x64xf32>
    %150 = vector.extract_strided_slice %145 {offsets = [0, 128], sizes = [8, 64], strides = [1, 1]} : vector<8x192xf32> to vector<8x64xf32>
    %151 = arith.mulf %149, %131 : vector<8x64xf32>
    %152 = arith.mulf %148, %147 : vector<8x64xf32>
    %153 = arith.addf %151, %152 : vector<8x64xf32>
    %154 = math.tanh %153 : vector<8x64xf32>
    %155 = arith.mulf %150, %154 : vector<8x64xf32>
    %c7_i32 = arith.constant 7 : i32
    %156 = arith.index_cast %c7_i32 : i32 to index
    %c0_42 = arith.constant 0 : index
    %c0_43 = arith.constant 0 : index
    %157 = vector.load %arg1[%156, %c0_42, %c0_43] : memref<8x8x256xf32, #tpu.memory_space<vmem>>, vector<1x8x256xf32>
    %158 = vector.shape_cast %157 : vector<1x8x256xf32> to vector<8x256xf32>
    %c0_44 = arith.constant 0 : index
    %c0_45 = arith.constant 0 : index
    %159 = vector.load %arg2[%c0_44, %c0_45] : memref<64x256xf32, #tpu.memory_space<vmem>>, vector<64x256xf32>
    %cst_46 = arith.constant dense<0.000000e+00> : vector<8x256xf32>
    %160 = tpu.matmul %155, %159, %cst_46 {dimension_numbers = #tpu.dot_dimension_numbers<[1], [0], [0], [1], [0, 0, 1, 1], [], []>} : vector<8x64xf32>, vector<64x256xf32>, vector<8x256xf32> -> vector<8x256xf32>
    %161 = arith.addf %158, %160 : vector<8x256xf32>
    %162 = vector.extract_strided_slice %161 {offsets = [0, 0], sizes = [8, 192], strides = [1, 1]} : vector<8x256xf32> to vector<8x192xf32>
    %163 = arith.negf %162 : vector<8x192xf32>
    %164 = math.exp %163 : vector<8x192xf32>
    %cst_47 = arith.constant 1.000000e+00 : f32
    %165 = vector.broadcast %cst_47 : f32 to vector<8x192xf32>
    %166 = arith.addf %165, %164 : vector<8x192xf32>
    %167 = arith.divf %165, %166 : vector<8x192xf32>
    %168 = vector.extract_strided_slice %161 {offsets = [0, 192], sizes = [8, 64], strides = [1, 1]} : vector<8x256xf32> to vector<8x64xf32>
    %169 = math.tanh %168 : vector<8x64xf32>
    %170 = vector.extract_strided_slice %167 {offsets = [0, 0], sizes = [8, 64], strides = [1, 1]} : vector<8x192xf32> to vector<8x64xf32>
    %171 = vector.extract_strided_slice %167 {offsets = [0, 64], sizes = [8, 64], strides = [1, 1]} : vector<8x192xf32> to vector<8x64xf32>
    %172 = vector.extract_strided_slice %167 {offsets = [0, 128], sizes = [8, 64], strides = [1, 1]} : vector<8x192xf32> to vector<8x64xf32>
    %173 = arith.mulf %171, %153 : vector<8x64xf32>
    %174 = arith.mulf %170, %169 : vector<8x64xf32>
    %175 = arith.addf %173, %174 : vector<8x64xf32>
    %176 = math.tanh %175 : vector<8x64xf32>
    %177 = arith.mulf %172, %176 : vector<8x64xf32>
    %c8_i32 = arith.constant 8 : i32
    %c0_48 = arith.constant 0 : index
    %c0_49 = arith.constant 0 : index
    %178 = vector.load %arg3[%c0_48, %c0_49] : memref<64x128xf32, #tpu.memory_space<vmem>>, vector<64x128xf32>
    %cst_50 = arith.constant dense<0.000000e+00> : vector<8x128xf32>
    %179 = tpu.matmul %177, %178, %cst_50 {dimension_numbers = #tpu.dot_dimension_numbers<[1], [0], [0], [1], [0, 0, 1, 1], [], []>} : vector<8x64xf32>, vector<64x128xf32>, vector<8x128xf32> -> vector<8x128xf32>
    %c0_51 = arith.constant 0 : index
    %c0_52 = arith.constant 0 : index
    %180 = vector.load %arg4[%c0_51, %c0_52] : memref<1x128xf32, #tpu.memory_space<vmem>>, vector<1x128xf32>
    %181 = vector.broadcast %180 : vector<1x128xf32> to vector<8x128xf32>
    %182 = arith.addf %179, %181 : vector<8x128xf32>
    %cst_53 = arith.constant dense<0xFF800000> : vector<8xf32>
    %183 = vector.multi_reduction <maximumf>, %182, %cst_53 [1] : vector<8x128xf32> to vector<8xf32>
    %184 = vector.shape_cast %183 : vector<8xf32> to vector<8x1xf32>
    %185 = vector.broadcast %184 : vector<8x1xf32> to vector<8x128xf32>
    %186 = arith.subf %182, %185 : vector<8x128xf32>
    %187 = math.exp %186 : vector<8x128xf32>
    %cst_54 = arith.constant dense<0.000000e+00> : vector<8xf32>
    %188 = vector.multi_reduction <add>, %187, %cst_54 [1] : vector<8x128xf32> to vector<8xf32>
    %189 = vector.shape_cast %188 : vector<8xf32> to vector<8x1xf32>
    %190 = math.log %189 : vector<8x1xf32>
    %191 = arith.addf %190, %184 : vector<8x1xf32>
    %192 = vector.broadcast %191 : vector<8x1xf32> to vector<8x128xf32>
    %193 = arith.subf %182, %192 : vector<8x128xf32>
    %c0_55 = arith.constant 0 : index
    %c0_56 = arith.constant 0 : index
    %194 = vector.load %arg5[%c0_55, %c0_56] : memref<8x128xf32, #tpu.memory_space<vmem>>, vector<8x128xf32>
    tpu.vector_store %arg5[%c0_55, %c0_56], %193 {strides = array<i32>} : memref<8x128xf32, #tpu.memory_space<vmem>>, vector<8x128xf32>,
    return
  }
  func.func @transform_0(%arg0: i32) -> (i32, i32, i32) {
    %c0_i32 = arith.constant 0 : i32
    %c0_i32_0 = arith.constant 0 : i32
    %c0_i32_1 = arith.constant 0 : i32
    %c0_i32_2 = arith.constant 0 : i32
    return %c0_i32, %c0_i32_0, %c0_i32_1 : i32, i32, i32
  }
  func.func @transform_1(%arg0: i32) -> (i32, i32) {
    %c0_i32 = arith.constant 0 : i32
    %c0_i32_0 = arith.constant 0 : i32
    %c0_i32_1 = arith.constant 0 : i32
    return %c0_i32, %c0_i32_0 : i32, i32
  }
  func.func @transform_2(%arg0: i32) -> (i32, i32) {
    %c0_i32 = arith.constant 0 : i32
    %c0_i32_0 = arith.constant 0 : i32
    %c0_i32_1 = arith.constant 0 : i32
    return %c0_i32, %c0_i32_0 : i32, i32
  }
  func.func @transform_3(%arg0: i32) -> (i32, i32) {
    %c0_i32 = arith.constant 0 : i32
    %c0_i32_0 = arith.constant 0 : i32
    %c0_i32_1 = arith.constant 0 : i32
    return %c0_i32, %c0_i32_0 : i32, i32
  }
  func.func @transform_4(%arg0: i32) -> (i32, i32) {
    %c0_i32 = arith.constant 0 : i32
    %c0_i32_0 = arith.constant 0 : i32
    %c0_i32_1 = arith.constant 0 : i32
    return %c0_i32, %c0_i32_0 : i32, i32
  }
}

</mosaic_0001>

<bundles_post_ra>
// kernel: tpu_custom_call.1
= control target key start
LH: loop header
LB: loop body
LE: loop exit
PB: predicated region body
PF: predicated region fallthrough
CT: control target
= control target key end

     0   :  { %9 = vsyncpa [#allocation3], 0  ;;  %s1487_s0 = inlined_call_operand.hbm [shape: f32[8,8,256], index: 0, kind: input, shape index: {}]   ;;  %s1488_s1 = inlined_call_operand.hbm [shape: f32[64,256], index: 1, kind: input, shape index: {}]   ;;  %s1489_s2 = inlined_call_operand.hbm [shape: f32[64,128], index: 2, kind: input, shape index: {}]   ;;  %s1490_s3 = inlined_call_operand.vmem [shape: f32[1,128], index: 3, kind: input, shape index: {}]   ;;  %s1491_s4 = inlined_call_operand.hbm [shape: f32[8,128], index: 4, kind: output, shape index: {}]  }
   0x1   :  { %10 = vsyncpa [#allocation6], 0 }
   0x2   :  { %11 = vsyncpa [#allocation4], 0  ;;  %s29_s17 = sshll.u32 %s1488_s1, 4  ;;  %s1222_s18 = smov [#allocation5]   ;;  %s30_s17 = int_to_ptr.hbm [resolvable:$true] %s29_s17 }
   0x3   :  { %s31_s19 = sshll.u32 %s1222_s18, 4  ;;  %s16_s22 = sshll.u32 %s1487_s0, 4  ;;  %s32_s19 = int_to_ptr.vmem [resolvable:$true] %s31_s19  ;;  %s17_s22 = int_to_ptr.hbm [resolvable:$true] %s16_s22 }
   0x4   :  { %s1223_s23 = smov 256   ;;  %s1224_s24 = smov 16  }
   0x5   :  { %37 = dma.hbm_to_vmem [thread:$0]  %s30_s17, 2048, %s32_s19, [#allocation6], %s1223_s23, %s1223_s23, %s1224_s24  }
   0x6   :  { %s1225_s25 = smov [#allocation2]   ;;  %s42_s29 = sshll.u32 %s1489_s2, 4  ;;  %s43_s29 = int_to_ptr.hbm [resolvable:$true] %s42_s29 }
   0x7   :  { %s18_s26 = sshll.u32 %s1225_s25, 4  ;;  %s1226_s1 = smov [#allocation7]   ;;  %s19_s26 = int_to_ptr.vmem [resolvable:$true] %s18_s26 }
   0x8   :  { %24 = dma.hbm_to_vmem [thread:$0]  %s17_s22, 2048, %s19_s26, [#allocation3], %s1223_s23, %s1223_s23, %s1224_s24  }
   0x9   :  { %s44_s30 = sshll.u32 %s1226_s1, 4  ;;  %s1227_s5 = smov 128   ;;  %s45_s30 = int_to_ptr.vmem [resolvable:$true] %s44_s30 }
   0xa   :  { %s1228_s6 = smov 8  }
   0xb   :  { %50 = dma.hbm_to_vmem [thread:$0]  %s43_s29, 1024, %s45_s30, [#allocation6], %s1227_s5, %s1227_s5, %s1228_s6  }
   0xc   :  { %1216 = dma.done.wait [#allocation3], 2048  }
   0xd   :  { %1217 = vsyncadd [#allocation3], 4294965248 }
   0xe   :  { %1218 = dma.done.wait [#allocation6], 3072  }
   0xf   :  { %1219 = vsyncadd [#allocation6], 4294964224  ;;  %v1266_v0 = vld [vmem:[#allocation5 + $0x78] sm:$0xff]  ;;  %v1268_v1 = vld [vmem:[#allocation5 + $0x68] sm:$0xff]  ;;  %v1229_v16 = vmov 0.0   ;;  %s1230_s0 = smov 64  }
  0x10   :  { %115 = vmatpush.msra.mxu1 %v1266_v0  ;;  %219 = vmatpush.msra.mxu3 %v1266_v0  ;;  %v1272_v2 = vld [vmem:[#allocation5 + $0x58] sm:$0xff]  ;;  %v1274_v3 = vld [vmem:[#allocation5 + $0x70] sm:$0xff]  ;;  %v1278_v4 = vld [vmem:[#allocation5 + $0x60] sm:$0xff]  ;;  %vm83_vm8 = vcmask 523264   ;;  %s1231_s8 = smov [#allocation8]   ;;  %s967_s12 = sshll.u32 %s1491_s4, 4  ;;  %s968_s12 = int_to_ptr.hbm [resolvable:$true] %s967_s12 }
  0x11   :  { %95 = vmatpush.msra.mxu0 %v1274_v3  ;;  %v1280_v5 = vld [vmem:[#allocation5 + $0x48] sm:$0xff]  ;;  %v1282_v6 = vld [vmem:[#allocation5 + $0x50] sm:$0xff]  ;;  %199 = vmatpush.msra.mxu2 %v1274_v3  ;;  %v1288_v7 = vld [vmem:[#allocation5 + $0x38] sm:$0xff]  ;;  %s965_s9 = sshll.u32 %s1231_s8, 4  ;;  %s966_s9 = int_to_ptr.vmem [resolvable:$true] %s965_s9 }
  0x12   :  { %116 = vmatpush.msra.mxu1 %v1268_v1  ;;  %220 = vmatpush.msra.mxu3 %v1268_v1  ;;  %v1290_v8 = vld [vmem:[#allocation5 + $0x40] sm:$0xff]  ;;  %v1296_v9 = vld [vmem:[#allocation5 + $0x28] sm:$0xff]  ;;  %v1298_v10 = vld [vmem:[#allocation5 + $0x30] sm:$0xff] }
  0x13   :  { %96 = vmatpush.msra.mxu0 %v1278_v4  ;;  %200 = vmatpush.msra.mxu2 %v1278_v4  ;;  %v1304_v11 = vld [vmem:[#allocation5 + $0x18] sm:$0xff]  ;;  %v1306_v12 = vld [vmem:[#allocation5 + $0x20] sm:$0xff]  ;;  %v1312_v13 = vld [vmem:[#allocation5 + $0x8] sm:$0xff] }
  0x14   :  { %117 = vmatpush.msra.mxu1 %v1272_v2  ;;  %221 = vmatpush.msra.mxu3 %v1272_v2  ;;  %v1314_v14 = vld [vmem:[#allocation5 + $0x10] sm:$0xff]  ;;  %v1320_v15 = vld [vmem:[#allocation5] sm:$0xff]  ;;  %v66_v17 = vld [vmem:[#allocation2 + $0x8] sm:$0xff] }
  0x15   :  { %97 = vmatpush.msra.mxu0 %v1282_v6  ;;  %201 = vmatpush.msra.mxu2 %v1282_v6  ;;  %v65_v21 = vld [vmem:[#allocation2] sm:$0xff]  ;;  %v187_v58 = vld [vmem:[#allocation2 + $0x18] sm:$0xff]  ;;  %v186_v62 = vld [vmem:[#allocation2 + $0x10] sm:$0xff] }
  0x16   :  { %118 = vmatpush.msra.mxu1 %v1280_v5  ;;  %222 = vmatpush.msra.mxu3 %v1280_v5 }
  0x17   :  { %98 = vmatpush.msra.mxu0 %v1290_v8  ;;  %202 = vmatpush.msra.mxu2 %v1290_v8 }
  0x18   :  { %119 = vmatpush.msra.mxu1 %v1288_v7  ;;  %223 = vmatpush.msra.mxu3 %v1288_v7 }
  0x19   :  { %99 = vmatpush.msra.mxu0 %v1298_v10  ;;  %203 = vmatpush.msra.mxu2 %v1298_v10 }
  0x1a   :  { %120 = vmatpush.msra.mxu1 %v1296_v9  ;;  %224 = vmatpush.msra.mxu3 %v1296_v9 }
  0x1b   :  { %100 = vmatpush.msra.mxu0 %v1306_v12  ;;  %204 = vmatpush.msra.mxu2 %v1306_v12 }
  0x1c   :  { %121 = vmatpush.msra.mxu1 %v1304_v11  ;;  %225 = vmatpush.msra.mxu3 %v1304_v11 }
  0x1d   :  { %101 = vmatpush.msra.mxu0 %v1314_v14  ;;  %205 = vmatpush.msra.mxu2 %v1314_v14 }
  0x1e   :  { %122 = vmatpush.msra.mxu1 %v1312_v13  ;;  %226 = vmatpush.msra.mxu3 %v1312_v13 }
  0x1f   :  { %123 = vmatmul.f32.vlgmr.msra.gmra.mxu1 %v1229_v16  ;;  %102 = vmatpush.msra.mxu0 %v1320_v15 }
  0x20   :  { %103 = vmatmul.f32.vlgmr.msra.gmra.mxu0 %v1229_v16  ;;  %206 = vmatpush.msra.mxu2 %v1320_v15 }
  0x21   :  { %303 = vmatpush.msrb.mxu0 %v1274_v3  ;;  %323 = vmatpush.msrb.mxu1 %v1266_v0 }
  0x22   :  { %407 = vmatpush.msrb.mxu2 %v1274_v3  ;;  %427 = vmatpush.msrb.mxu3 %v1266_v0 }
  0x23   :  { %304 = vmatpush.msrb.mxu0 %v1278_v4  ;;  %324 = vmatpush.msrb.mxu1 %v1268_v1 }
  0x24   :  { %408 = vmatpush.msrb.mxu2 %v1278_v4  ;;  %428 = vmatpush.msrb.mxu3 %v1268_v1 }
  0x25   :  { %305 = vmatpush.msrb.mxu0 %v1282_v6  ;;  %325 = vmatpush.msrb.mxu1 %v1272_v2 }
  0x26   :  { %409 = vmatpush.msrb.mxu2 %v1282_v6  ;;  %429 = vmatpush.msrb.mxu3 %v1272_v2 }
  0x27   :  { %306 = vmatpush.msrb.mxu0 %v1290_v8  ;;  %326 = vmatpush.msrb.mxu1 %v1280_v5 }
  0x28   :  { %410 = vmatpush.msrb.mxu2 %v1290_v8  ;;  %430 = vmatpush.msrb.mxu3 %v1280_v5 }
  0x29   :  { %307 = vmatpush.msrb.mxu0 %v1298_v10  ;;  %327 = vmatpush.msrb.mxu1 %v1288_v7 }
  0x2a   :  { %411 = vmatpush.msrb.mxu2 %v1298_v10  ;;  %431 = vmatpush.msrb.mxu3 %v1288_v7 }
  0x2b   :  { %308 = vmatpush.msrb.mxu0 %v1306_v12  ;;  %328 = vmatpush.msrb.mxu1 %v1296_v9 }
  0x2c   :  { %412 = vmatpush.msrb.mxu2 %v1306_v12  ;;  %432 = vmatpush.msrb.mxu3 %v1296_v9 }
  0x2d   :  { %309 = vmatpush.msrb.mxu0 %v1314_v14  ;;  %329 = vmatpush.msrb.mxu1 %v1304_v11 }
  0x2e   :  { %413 = vmatpush.msrb.mxu2 %v1314_v14  ;;  %433 = vmatpush.msrb.mxu3 %v1304_v11 }
  0x2f   :  { %310 = vmatpush.msrb.mxu0 %v1320_v15  ;;  %330 = vmatpush.msrb.mxu1 %v1312_v13 }
  0x30   :  { %414 = vmatpush.msrb.mxu2 %v1320_v15  ;;  %434 = vmatpush.msrb.mxu3 %v1312_v13 }
  0x31   :  { %511 = vmatpush.msra.mxu0 %v1274_v3  ;;  %531 = vmatpush.msra.mxu1 %v1266_v0 }
  0x33   :  { %512 = vmatpush.msra.mxu0 %v1278_v4  ;;  %532 = vmatpush.msra.mxu1 %v1268_v1 }
  0x35   :  { %513 = vmatpush.msra.mxu0 %v1282_v6  ;;  %533 = vmatpush.msra.mxu1 %v1272_v2 }
  0x37   :  { %514 = vmatpush.msra.mxu0 %v1290_v8  ;;  %534 = vmatpush.msra.mxu1 %v1280_v5 }
  0x39   :  { %515 = vmatpush.msra.mxu0 %v1298_v10  ;;  %535 = vmatpush.msra.mxu1 %v1288_v7 }
  0x3b   :  { %516 = vmatpush.msra.mxu0 %v1306_v12  ;;  %536 = vmatpush.msra.mxu1 %v1296_v9 }
  0x3d   :  { %517 = vmatpush.msra.mxu0 %v1314_v14  ;;  %537 = vmatpush.msra.mxu1 %v1304_v11 }
  0x3f   :  { %518 = vmatpush.msra.mxu0 %v1320_v15  ;;  %538 = vmatpush.msra.mxu1 %v1312_v13 }
  0x9c   :  { %v124_v18 = vpop.f32.mrf.mxu1 }
  0x9d   :  { %v128_v19 = vadd.f32 %v124_v18, %v66_v17  ;;  %v104_v22 = vpop.f32.mrf.mxu0 }
  0x9e   :  { %v127_v23 = vadd.f32 %v104_v22, %v65_v21 }
  0x9f   :  { %1020 = vtanh.f32 %v128_v19  ;;  %v979_v43 = vmul.f32 -1.442695, %v128_v19 }
  0xa0   :  { %v978_v24 = vmul.f32 -1.442695, %v127_v23 }
  0xa2   :  { %1022 = vpow2.f32 %v978_v24 }
  0xa5   :  { %v1021_v20 = vpop.eup %1020 }
  0xa6   :  { %170 = vrot.lane.b32.xlu0 %v1021_v20, %s1230_s0 }
  0xa8   :  { %v1023_v25 = vpop.eup %1022 }
  0xa9   :  { %v135_v26 = vadd.f32 1.0, %v1023_v25 }
  0xab   :  { %1024 = vrcp.f32 %v135_v26  ;;  %vm142_vm0 = vweird.f32 %v135_v26  ;;  %v148_v31 = vand.u32 2147483648, %v135_v26  ;;  %v146_v33 = vand.u32 2147483647, %v135_v26 }
  0xad   :  { %v149_v34 = vor.u32 1.1754944e-38, %v148_v31  ;;  %vm147_vm3 = vcmp.eq.f32.partialorder %v146_v33, 8.507059e+37 }
  0xb1   :  { %v1025_v27 = vpop.eup %1024 }
  0xb2   :  { %v138_v28 = vmul.f32 %v1025_v27, %v135_v26  ;;  %vm143_vm1 = vweird.f32 %v1025_v27 }
  0xb3   :  { %vm144_vm2 = vmor %vm142_vm0, %vm143_vm1 }
  0xb4   :  { %v139_v29 = vsub.f32 1.0, %v138_v28 }
  0xb6   :  { %v140_v30 = vmul.f32 %v1025_v27, %v139_v29 }
  0xb8   :  { %v141_v32 = vadd.f32 %v1025_v27, %v140_v30 }
  0xba   :  { %v145_v35 = vsel %vm144_vm2, %v1025_v27, %v141_v32 }
  0xbb   :  { %v150_v37 = vsel %vm147_vm3, %v149_v34, %v145_v35 }
  0xbc   :  { %v168_v39 = vmul.f32 0.0, %v150_v37 }
 0x118   :  { %v171_v36 = vpop.permute.xlu0 %170 }
 0x119   :  { %v173_v38 = vmul.f32 %v171_v36, %v150_v37 }
 0x11b   :  { %175 = vrot.lane.b32.xlu0 %v173_v38, %s1230_s0 }
 0x18d   :  { %v176_v40 = vpop.permute.xlu0 %175 }
 0x18e   :  { %v1380_v41 = vadd.f32 %v176_v40, %v168_v39 }
 0x190   :  { %1026 = vtanh.f32 %v1380_v41 }
 0x191   :  { %1028 = vpow2.f32 %v979_v43 }
 0x196   :  { %v1027_v42 = vpop.eup %1026 }
 0x197   :  { %181 = vrot.lane.b32.xlu1 %v1027_v42, %s1230_s0  ;;  %v1029_v44 = vpop.eup %1028 }
 0x198   :  { %v136_v45 = vadd.f32 1.0, %v1029_v44 }
 0x19a   :  { %1030 = vrcp.f32 %v136_v45  ;;  %v163_v51 = vand.u32 2147483648, %v136_v45  ;;  %vm157_vm5 = vweird.f32 %v136_v45  ;;  %v161_v52 = vand.u32 2147483647, %v136_v45 }
 0x19c   :  { %v164_v54 = vor.u32 1.1754944e-38, %v163_v51  ;;  %vm162_vm7 = vcmp.eq.f32.partialorder %v161_v52, 8.507059e+37  ;;  %v291_v51 = vld [vmem:[#allocation2 + $0x28] sm:$0xff] }
 0x1a0   :  { %v1031_v46 = vpop.eup %1030 }
 0x1a1   :  { %v153_v47 = vmul.f32 %v1031_v46, %v136_v45  ;;  %vm158_vm4 = vweird.f32 %v1031_v46 }
 0x1a2   :  { %vm159_vm6 = vmor %vm157_vm5, %vm158_vm4 }
 0x1a3   :  { %v154_v48 = vsub.f32 1.0, %v153_v47 }
 0x1a5   :  { %v155_v49 = vmul.f32 %v1031_v46, %v154_v48 }
 0x1a7   :  { %v156_v50 = vadd.f32 %v1031_v46, %v155_v49 }
 0x1a9   :  { %v160_v53 = vsel %vm159_vm6, %v1031_v46, %v156_v50 }
 0x1aa   :  { %v165_v55 = vsel %vm162_vm7, %v164_v54, %v160_v53 }
 0x209   :  { %v182_v56 = vpop.permute.xlu1 %181 }
 0x20a   :  { %v184_v57 = vmul.f32 %v182_v56, %v165_v55  ;;  %v290_v55 = vld [vmem:[#allocation2 + $0x20] sm:$0xff] }
 0x20c   :  { %980 = vmatmul.msk.f32.vlgmr.msra.gmra.mxu2 %vm83_vm8, %v184_v57  ;;  %981 = vmatmul.msk.f32.vlgmr.msra.gmra.mxu3 %vm83_vm8, %v184_v57 }
 0x20d   :  { %615 = vmatpush.msra.mxu2 %v1274_v3  ;;  %635 = vmatpush.msra.mxu3 %v1266_v0 }
 0x20f   :  { %616 = vmatpush.msra.mxu2 %v1278_v4  ;;  %636 = vmatpush.msra.mxu3 %v1268_v1 }
 0x211   :  { %617 = vmatpush.msra.mxu2 %v1282_v6  ;;  %637 = vmatpush.msra.mxu3 %v1272_v2 }
 0x213   :  { %618 = vmatpush.msra.mxu2 %v1290_v8  ;;  %638 = vmatpush.msra.mxu3 %v1280_v5 }
 0x215   :  { %619 = vmatpush.msra.mxu2 %v1298_v10  ;;  %639 = vmatpush.msra.mxu3 %v1288_v7 }
 0x217   :  { %620 = vmatpush.msra.mxu2 %v1306_v12  ;;  %640 = vmatpush.msra.mxu3 %v1296_v9 }
 0x219   :  { %621 = vmatpush.msra.mxu2 %v1314_v14  ;;  %641 = vmatpush.msra.mxu3 %v1304_v11 }
 0x21b   :  { %622 = vmatpush.msra.mxu2 %v1320_v15  ;;  %642 = vmatpush.msra.mxu3 %v1312_v13 }
 0x28f   :  { %v228_v59 = vpop.f32.mrf.mxu3  ;;  %v208_v63 = vpop.f32.mrf.mxu2 }
 0x290   :  { %v232_v60 = vadd.f32 %v228_v59, %v187_v58  ;;  %v231_v16 = vadd.f32 %v208_v63, %v186_v62 }
 0x292   :  { %1032 = vtanh.f32 %v232_v60  ;;  %v982_v17 = vmul.f32 -1.442695, %v231_v16  ;;  %v983_v36 = vmul.f32 -1.442695, %v232_v60 }
 0x294   :  { %1034 = vpow2.f32 %v982_v17 }
 0x298   :  { %v1033_v61 = vpop.eup %1032 }
 0x299   :  { %274 = vrot.lane.b32.xlu1 %v1033_v61, %s1230_s0 }
 0x29a   :  { %v1035_v18 = vpop.eup %1034 }
 0x29b   :  { %v239_v19 = vadd.f32 1.0, %v1035_v18 }
 0x29d   :  { %1036 = vrcp.f32 %v239_v19  ;;  %v252_v25 = vand.u32 2147483648, %v239_v19  ;;  %vm246_vm10 = vweird.f32 %v239_v19  ;;  %v250_v26 = vand.u32 2147483647, %v239_v19 }
 0x29f   :  { %v253_v28 = vor.u32 1.1754944e-38, %v252_v25  ;;  %vm251_vm12 = vcmp.eq.f32.partialorder %v250_v26, 8.507059e+37 }
 0x2a3   :  { %v1037_v20 = vpop.eup %1036 }
 0x2a4   :  { %v242_v21 = vmul.f32 %v1037_v20, %v239_v19  ;;  %vm247_vm9 = vweird.f32 %v1037_v20 }
 0x2a5   :  { %vm248_vm11 = vmor %vm246_vm10, %vm247_vm9 }
 0x2a6   :  { %v243_v22 = vsub.f32 1.0, %v242_v21 }
 0x2a8   :  { %v244_v23 = vmul.f32 %v1037_v20, %v243_v22 }
 0x2aa   :  { %v245_v24 = vadd.f32 %v1037_v20, %v244_v23 }
 0x2ac   :  { %v249_v27 = vsel %vm248_vm11, %v1037_v20, %v245_v24 }
 0x2ad   :  { %v254_v30 = vsel %vm251_vm12, %v253_v28, %v249_v27 }
 0x2ae   :  { %v272_v32 = vmul.f32 %v254_v30, %v1380_v41 }
 0x30b   :  { %v275_v29 = vpop.permute.xlu1 %274 }
 0x30c   :  { %v277_v31 = vmul.f32 %v275_v29, %v254_v30 }
 0x30e   :  { %279 = vrot.lane.b32.xlu2 %v277_v31, %s1230_s0 }
 0x368   :  { %v280_v33 = vpop.permute.xlu2 %279 }
 0x369   :  { %v1405_v34 = vadd.f32 %v280_v33, %v272_v32 }
 0x36b   :  { %1038 = vtanh.f32 %v1405_v34 }
 0x36c   :  { %1040 = vpow2.f32 %v983_v36 }
 0x371   :  { %v1039_v35 = vpop.eup %1038 }
 0x372   :  { %285 = vrot.lane.b32.xlu2 %v1039_v35, %s1230_s0  ;;  %v1041_v37 = vpop.eup %1040 }
 0x373   :  { %v240_v38 = vadd.f32 1.0, %v1041_v37 }
 0x375   :  { %1042 = vrcp.f32 %v240_v38  ;;  %v267_v41 = vand.u32 2147483648, %v240_v38  ;;  %vm261_vm14 = vweird.f32 %v240_v38  ;;  %v265_v45 = vand.u32 2147483647, %v240_v38 }
 0x377   :  { %v268_v47 = vor.u32 1.1754944e-38, %v267_v41  ;;  %vm266_vm0 = vcmp.eq.f32.partialorder %v265_v45, 8.507059e+37 }
 0x37b   :  { %v1043_v39 = vpop.eup %1042 }
 0x37c   :  { %v257_v40 = vmul.f32 %v1043_v39, %v240_v38  ;;  %vm262_vm13 = vweird.f32 %v1043_v39 }
 0x37d   :  { %vm263_vm15 = vmor %vm261_vm14, %vm262_vm13 }
 0x37e   :  { %v258_v42 = vsub.f32 1.0, %v257_v40 }
 0x380   :  { %v259_v43 = vmul.f32 %v1043_v39, %v258_v42 }
 0x382   :  { %v260_v44 = vadd.f32 %v1043_v39, %v259_v43 }
 0x384   :  { %v264_v46 = vsel %vm263_vm15, %v1043_v39, %v260_v44 }
 0x385   :  { %v269_v48 = vsel %vm266_vm0, %v268_v47, %v264_v46 }
 0x3cc   :  { %v286_v49 = vpop.permute.xlu2 %285 }
 0x3cd   :  { %v288_v50 = vmul.f32 %v286_v49, %v269_v48 }
 0x3cf   :  { %984 = vmatmul.msk.f32.vlgmr.msrb.gmra.mxu0 %vm83_vm8, %v288_v50  ;;  %985 = vmatmul.msk.f32.vlgmr.msrb.gmra.mxu1 %vm83_vm8, %v288_v50 }
 0x3d0   :  { %719 = vmatpush.msrb.mxu0 %v1274_v3  ;;  %739 = vmatpush.msrb.mxu1 %v1266_v0 }
 0x3d2   :  { %720 = vmatpush.msrb.mxu0 %v1278_v4  ;;  %740 = vmatpush.msrb.mxu1 %v1268_v1 }
 0x3d4   :  { %721 = vmatpush.msrb.mxu0 %v1282_v6  ;;  %741 = vmatpush.msrb.mxu1 %v1272_v2 }
 0x3d6   :  { %722 = vmatpush.msrb.mxu0 %v1290_v8  ;;  %742 = vmatpush.msrb.mxu1 %v1280_v5 }
 0x3d8   :  { %723 = vmatpush.msrb.mxu0 %v1298_v10  ;;  %743 = vmatpush.msrb.mxu1 %v1288_v7 }
 0x3da   :  { %724 = vmatpush.msrb.mxu0 %v1306_v12  ;;  %744 = vmatpush.msrb.mxu1 %v1296_v9 }
 0x3dc   :  { %725 = vmatpush.msrb.mxu0 %v1314_v14  ;;  %745 = vmatpush.msrb.mxu1 %v1304_v11 }
 0x3de   :  { %726 = vmatpush.msrb.mxu0 %v1320_v15  ;;  %746 = vmatpush.msrb.mxu1 %v1312_v13 }
 0x44c   :  { %v332_v52 = vpop.f32.mrf.mxu1  ;;  %v312_v56 = vpop.f32.mrf.mxu0 }
 0x44d   :  { %v336_v53 = vadd.f32 %v332_v52, %v291_v51  ;;  %v335_v57 = vadd.f32 %v312_v56, %v290_v55 }
 0x44f   :  { %1044 = vtanh.f32 %v336_v53  ;;  %v986_v58 = vmul.f32 -1.442695, %v335_v57  ;;  %v987_v29 = vmul.f32 -1.442695, %v336_v53 }
 0x451   :  { %1046 = vpow2.f32 %v986_v58 }
 0x455   :  { %v1045_v54 = vpop.eup %1044 }
 0x456   :  { %378 = vrot.lane.b32.xlu0 %v1045_v54, %s1230_s0 }
 0x457   :  { %v1047_v59 = vpop.eup %1046 }
 0x458   :  { %v343_v60 = vadd.f32 1.0, %v1047_v59 }
 0x45a   :  { %1048 = vrcp.f32 %v343_v60  ;;  %v356_v18 = vand.u32 2147483648, %v343_v60  ;;  %vm350_vm2 = vweird.f32 %v343_v60  ;;  %v354_v19 = vand.u32 2147483647, %v343_v60 }
 0x45c   :  { %v357_v21 = vor.u32 1.1754944e-38, %v356_v18  ;;  %vm355_vm4 = vcmp.eq.f32.partialorder %v354_v19, 8.507059e+37 }
 0x460   :  { %v1049_v61 = vpop.eup %1048 }
 0x461   :  { %v346_v62 = vmul.f32 %v1049_v61, %v343_v60  ;;  %vm351_vm1 = vweird.f32 %v1049_v61 }
 0x462   :  { %vm352_vm3 = vmor %vm350_vm2, %vm351_vm1 }
 0x463   :  { %v347_v63 = vsub.f32 1.0, %v346_v62 }
 0x465   :  { %v348_v16 = vmul.f32 %v1049_v61, %v347_v63 }
 0x467   :  { %v349_v17 = vadd.f32 %v1049_v61, %v348_v16 }
 0x469   :  { %v353_v20 = vsel %vm352_vm3, %v1049_v61, %v349_v17 }
 0x46a   :  { %v358_v23 = vsel %vm355_vm4, %v357_v21, %v353_v20  ;;  %v499_v21 = vld [vmem:[#allocation2 + $0x48] sm:$0xff] }
 0x46b   :  { %v376_v25 = vmul.f32 %v358_v23, %v1405_v34 }
 0x4c8   :  { %v379_v22 = vpop.permute.xlu0 %378 }
 0x4c9   :  { %v381_v24 = vmul.f32 %v379_v22, %v358_v23 }
 0x4cb   :  { %383 = vrot.lane.b32.xlu1 %v381_v24, %s1230_s0 }
 0x53d   :  { %v384_v26 = vpop.permute.xlu1 %383 }
 0x53e   :  { %v1430_v27 = vadd.f32 %v384_v26, %v376_v25  ;;  %v498_v25 = vld [vmem:[#allocation2 + $0x40] sm:$0xff] }
 0x540   :  { %1050 = vtanh.f32 %v1430_v27 }
 0x541   :  { %1052 = vpow2.f32 %v987_v29 }
 0x546   :  { %v1051_v28 = vpop.eup %1050 }
 0x547   :  { %389 = vrot.lane.b32.xlu2 %v1051_v28, %s1230_s0  ;;  %v1053_v30 = vpop.eup %1052 }
 0x548   :  { %v344_v31 = vadd.f32 1.0, %v1053_v30 }
 0x54a   :  { %1054 = vrcp.f32 %v344_v31  ;;  %v371_v34 = vand.u32 2147483648, %v344_v31  ;;  %vm365_vm6 = vweird.f32 %v344_v31  ;;  %v369_v38 = vand.u32 2147483647, %v344_v31 }
 0x54c   :  { %v372_v40 = vor.u32 1.1754944e-38, %v371_v34  ;;  %vm370_vm9 = vcmp.eq.f32.partialorder %v369_v38, 8.507059e+37 }
 0x550   :  { %v1055_v32 = vpop.eup %1054 }
 0x551   :  { %v361_v33 = vmul.f32 %v1055_v32, %v344_v31  ;;  %vm366_vm5 = vweird.f32 %v1055_v32 }
 0x552   :  { %vm367_vm7 = vmor %vm365_vm6, %vm366_vm5 }
 0x553   :  { %v362_v35 = vsub.f32 1.0, %v361_v33 }
 0x555   :  { %v363_v36 = vmul.f32 %v1055_v32, %v362_v35 }
 0x557   :  { %v364_v37 = vadd.f32 %v1055_v32, %v363_v36 }
 0x559   :  { %v368_v39 = vsel %vm367_vm7, %v1055_v32, %v364_v37 }
 0x55a   :  { %v373_v42 = vsel %vm370_vm9, %v372_v40, %v368_v39 }
 0x5a1   :  { %v390_v43 = vpop.permute.xlu2 %389 }
 0x5a2   :  { %v392_v44 = vmul.f32 %v390_v43, %v373_v42 }
 0x5a4   :  { %988 = vmatmul.msk.f32.vlgmr.msrb.gmra.mxu2 %vm83_vm8, %v392_v44  ;;  %989 = vmatmul.msk.f32.vlgmr.msrb.gmra.mxu3 %vm83_vm8, %v392_v44 }
 0x5a5   :  { %823 = vmatpush.msrb.mxu2 %v1274_v3  ;;  %843 = vmatpush.msrb.mxu3 %v1266_v0  ;;  %v395_v0 = vld [vmem:[#allocation2 + $0x38] sm:$0xff] }
 0x5a7   :  { %824 = vmatpush.msrb.mxu2 %v1278_v4  ;;  %844 = vmatpush.msrb.mxu3 %v1268_v1  ;;  %v394_v4 = vld [vmem:[#allocation2 + $0x30] sm:$0xff] }
 0x5a9   :  { %825 = vmatpush.msrb.mxu2 %v1282_v6  ;;  %845 = vmatpush.msrb.mxu3 %v1272_v2 }
 0x5ab   :  { %826 = vmatpush.msrb.mxu2 %v1290_v8  ;;  %846 = vmatpush.msrb.mxu3 %v1280_v5 }
 0x5ad   :  { %827 = vmatpush.msrb.mxu2 %v1298_v10  ;;  %847 = vmatpush.msrb.mxu3 %v1288_v7 }
 0x5af   :  { %828 = vmatpush.msrb.mxu2 %v1306_v12  ;;  %848 = vmatpush.msrb.mxu3 %v1296_v9 }
 0x5b1   :  { %829 = vmatpush.msrb.mxu2 %v1314_v14  ;;  %849 = vmatpush.msrb.mxu3 %v1304_v11 }
 0x5b3   :  { %830 = vmatpush.msrb.mxu2 %v1320_v15  ;;  %850 = vmatpush.msrb.mxu3 %v1312_v13 }
 0x627   :  { %v436_v1 = vpop.f32.mrf.mxu3  ;;  %v416_v5 = vpop.f32.mrf.mxu2 }
 0x628   :  { %v440_v2 = vadd.f32 %v436_v1, %v395_v0  ;;  %v439_v6 = vadd.f32 %v416_v5, %v394_v4 }
 0x62a   :  { %1056 = vtanh.f32 %v440_v2  ;;  %v990_v7 = vmul.f32 -1.442695, %v439_v6  ;;  %v991_v54 = vmul.f32 -1.442695, %v440_v2 }
 0x62c   :  { %1058 = vpow2.f32 %v990_v7 }
 0x630   :  { %v1057_v3 = vpop.eup %1056 }
 0x631   :  { %482 = vrot.lane.b32.xlu0 %v1057_v3, %s1230_s0 }
 0x632   :  { %v1059_v8 = vpop.eup %1058 }
 0x633   :  { %v447_v9 = vadd.f32 1.0, %v1059_v8 }
 0x635   :  { %1060 = vrcp.f32 %v447_v9  ;;  %v460_v15 = vand.u32 2147483648, %v447_v9  ;;  %vm454_vm11 = vweird.f32 %v447_v9  ;;  %v458_v41 = vand.u32 2147483647, %v447_v9 }
 0x637   :  { %v461_v46 = vor.u32 1.1754944e-38, %v460_v15  ;;  %vm459_vm13 = vcmp.eq.f32.partialorder %v458_v41, 8.507059e+37 }
 0x63b   :  { %v1061_v10 = vpop.eup %1060 }
 0x63c   :  { %v450_v11 = vmul.f32 %v1061_v10, %v447_v9  ;;  %vm455_vm10 = vweird.f32 %v1061_v10 }
 0x63d   :  { %vm456_vm12 = vmor %vm454_vm11, %vm455_vm10 }
 0x63e   :  { %v451_v12 = vsub.f32 1.0, %v450_v11 }
 0x640   :  { %v452_v14 = vmul.f32 %v1061_v10, %v451_v12 }
 0x642   :  { %v453_v13 = vadd.f32 %v1061_v10, %v452_v14 }
 0x644   :  { %v457_v45 = vsel %vm456_vm12, %v1061_v10, %v453_v13 }
 0x645   :  { %v462_v48 = vsel %vm459_vm13, %v461_v46, %v457_v45  ;;  %v603_v46 = vld [vmem:[#allocation2 + $0x58] sm:$0xff] }
 0x646   :  { %v480_v50 = vmul.f32 %v462_v48, %v1430_v27 }
 0x6a3   :  { %v483_v47 = vpop.permute.xlu0 %482 }
 0x6a4   :  { %v485_v49 = vmul.f32 %v483_v47, %v462_v48 }
 0x6a6   :  { %487 = vrot.lane.b32.xlu1 %v485_v49, %s1230_s0 }
 0x718   :  { %v488_v51 = vpop.permute.xlu1 %487 }
 0x719   :  { %v490_v52 = vadd.f32 %v488_v51, %v480_v50  ;;  %v602_v50 = vld [vmem:[#allocation2 + $0x50] sm:$0xff] }
 0x71b   :  { %1062 = vtanh.f32 %v490_v52 }
 0x71c   :  { %1064 = vpow2.f32 %v991_v54 }
 0x721   :  { %v1063_v53 = vpop.eup %1062 }
 0x722   :  { %493 = vrot.lane.b32.xlu2 %v1063_v53, %s1230_s0  ;;  %v1065_v55 = vpop.eup %1064 }
 0x723   :  { %v448_v56 = vadd.f32 1.0, %v1065_v55 }
 0x725   :  { %1066 = vrcp.f32 %v448_v56  ;;  %v475_v62 = vand.u32 2147483648, %v448_v56  ;;  %vm469_vm15 = vweird.f32 %v448_v56  ;;  %v473_v63 = vand.u32 2147483647, %v448_v56 }
 0x727   :  { %v476_v17 = vor.u32 1.1754944e-38, %v475_v62  ;;  %vm474_vm1 = vcmp.eq.f32.partialorder %v473_v63, 8.507059e+37 }
 0x72b   :  { %v1067_v57 = vpop.eup %1066 }
 0x72c   :  { %v465_v58 = vmul.f32 %v1067_v57, %v448_v56  ;;  %vm470_vm14 = vweird.f32 %v1067_v57 }
 0x72d   :  { %vm471_vm0 = vmor %vm469_vm15, %vm470_vm14 }
 0x72e   :  { %v466_v59 = vsub.f32 1.0, %v465_v58 }
 0x730   :  { %v467_v60 = vmul.f32 %v1067_v57, %v466_v59 }
 0x732   :  { %v468_v61 = vadd.f32 %v1067_v57, %v467_v60 }
 0x734   :  { %v472_v16 = vsel %vm471_vm0, %v1067_v57, %v468_v61 }
 0x735   :  { %v477_v18 = vsel %vm474_vm1, %v476_v17, %v472_v16 }
 0x77c   :  { %v494_v19 = vpop.permute.xlu2 %493 }
 0x77d   :  { %v496_v20 = vmul.f32 %v494_v19, %v477_v18 }
 0x77f   :  { %992 = vmatmul.msk.f32.vlgmr.msra.gmra.mxu0 %vm83_vm8, %v496_v20  ;;  %993 = vmatmul.msk.f32.vlgmr.msra.gmra.mxu1 %vm83_vm8, %v496_v20 }
 0x7fc   :  { %v540_v22 = vpop.f32.mrf.mxu1  ;;  %v520_v26 = vpop.f32.mrf.mxu0 }
 0x7fd   :  { %v544_v23 = vadd.f32 %v540_v22, %v499_v21  ;;  %v543_v27 = vadd.f32 %v520_v26, %v498_v25 }
 0x7ff   :  { %1068 = vtanh.f32 %v544_v23  ;;  %v994_v28 = vmul.f32 -1.442695, %v543_v27  ;;  %v995_v3 = vmul.f32 -1.442695, %v544_v23 }
 0x801   :  { %1070 = vpow2.f32 %v994_v28 }
 0x805   :  { %v1069_v24 = vpop.eup %1068 }
 0x806   :  { %586 = vrot.lane.b32.xlu0 %v1069_v24, %s1230_s0 }
 0x807   :  { %v1071_v29 = vpop.eup %1070 }
 0x808   :  { %v551_v30 = vadd.f32 1.0, %v1071_v29 }
 0x80a   :  { %1072 = vrcp.f32 %v551_v30  ;;  %v564_v37 = vand.u32 2147483648, %v551_v30  ;;  %vm558_vm3 = vweird.f32 %v551_v30  ;;  %v562_v34 = vand.u32 2147483647, %v551_v30 }
 0x80c   :  { %v565_v39 = vor.u32 1.1754944e-38, %v564_v37  ;;  %vm563_vm5 = vcmp.eq.f32.partialorder %v562_v34, 8.507059e+37 }
 0x810   :  { %v1073_v31 = vpop.eup %1072 }
 0x811   :  { %v554_v32 = vmul.f32 %v1073_v31, %v551_v30  ;;  %vm559_vm2 = vweird.f32 %v1073_v31 }
 0x812   :  { %vm560_vm4 = vmor %vm558_vm3, %vm559_vm2 }
 0x813   :  { %v555_v33 = vsub.f32 1.0, %v554_v32 }
 0x815   :  { %v556_v35 = vmul.f32 %v1073_v31, %v555_v33 }
 0x817   :  { %v557_v36 = vadd.f32 %v1073_v31, %v556_v35 }
 0x819   :  { %v561_v38 = vsel %vm560_vm4, %v1073_v31, %v557_v36 }
 0x81a   :  { %v566_v42 = vsel %vm563_vm5, %v565_v39, %v561_v38  ;;  %v707_v39 = vld [vmem:[#allocation2 + $0x68] sm:$0xff] }
 0x81b   :  { %v584_v44 = vmul.f32 %v566_v42, %v490_v52 }
 0x878   :  { %v587_v40 = vpop.permute.xlu0 %586 }
 0x879   :  { %v589_v43 = vmul.f32 %v587_v40, %v566_v42 }
 0x87b   :  { %591 = vrot.lane.b32.xlu1 %v589_v43, %s1230_s0 }
 0x8ed   :  { %v592_v0 = vpop.permute.xlu1 %591 }
 0x8ee   :  { %v594_v1 = vadd.f32 %v592_v0, %v584_v44  ;;  %v706_v44 = vld [vmem:[#allocation2 + $0x60] sm:$0xff] }
 0x8f0   :  { %1074 = vtanh.f32 %v594_v1 }
 0x8f1   :  { %1076 = vpow2.f32 %v995_v3 }
 0x8f6   :  { %v1075_v2 = vpop.eup %1074 }
 0x8f7   :  { %597 = vrot.lane.b32.xlu2 %v1075_v2, %s1230_s0  ;;  %v1077_v4 = vpop.eup %1076 }
 0x8f8   :  { %v552_v5 = vadd.f32 1.0, %v1077_v4 }
 0x8fa   :  { %1078 = vrcp.f32 %v552_v5  ;;  %v579_v11 = vand.u32 2147483648, %v552_v5  ;;  %vm573_vm7 = vweird.f32 %v552_v5  ;;  %v577_v12 = vand.u32 2147483647, %v552_v5 }
 0x8fc   :  { %v580_v13 = vor.u32 1.1754944e-38, %v579_v11  ;;  %vm578_vm10 = vcmp.eq.f32.partialorder %v577_v12, 8.507059e+37 }
 0x900   :  { %v1079_v6 = vpop.eup %1078 }
 0x901   :  { %v569_v7 = vmul.f32 %v1079_v6, %v552_v5  ;;  %vm574_vm6 = vweird.f32 %v1079_v6 }
 0x902   :  { %vm575_vm9 = vmor %vm573_vm7, %vm574_vm6 }
 0x903   :  { %v570_v8 = vsub.f32 1.0, %v569_v7 }
 0x905   :  { %v571_v9 = vmul.f32 %v1079_v6, %v570_v8 }
 0x907   :  { %v572_v10 = vadd.f32 %v1079_v6, %v571_v9 }
 0x909   :  { %v576_v14 = vsel %vm575_vm9, %v1079_v6, %v572_v10 }
 0x90a   :  { %v581_v15 = vsel %vm578_vm10, %v580_v13, %v576_v14 }
 0x951   :  { %v598_v41 = vpop.permute.xlu2 %597 }
 0x952   :  { %v600_v45 = vmul.f32 %v598_v41, %v581_v15 }
 0x954   :  { %996 = vmatmul.msk.f32.vlgmr.msra.gmra.mxu2 %vm83_vm8, %v600_v45  ;;  %997 = vmatmul.msk.f32.vlgmr.msra.gmra.mxu3 %vm83_vm8, %v600_v45 }
 0x9d7   :  { %v644_v47 = vpop.f32.mrf.mxu3  ;;  %v624_v51 = vpop.f32.mrf.mxu2 }
 0x9d8   :  { %v648_v48 = vadd.f32 %v644_v47, %v603_v46  ;;  %v647_v52 = vadd.f32 %v624_v51, %v602_v50 }
 0x9da   :  { %1080 = vtanh.f32 %v648_v48  ;;  %v998_v53 = vmul.f32 -1.442695, %v647_v52  ;;  %v999_v24 = vmul.f32 -1.442695, %v648_v48 }
 0x9dc   :  { %1082 = vpow2.f32 %v998_v53 }
 0x9e0   :  { %v1081_v49 = vpop.eup %1080 }
 0x9e1   :  { %690 = vrot.lane.b32.xlu0 %v1081_v49, %s1230_s0 }
 0x9e2   :  { %v1083_v54 = vpop.eup %1082 }
 0x9e3   :  { %v655_v55 = vadd.f32 1.0, %v1083_v54 }
 0x9e5   :  { %1084 = vrcp.f32 %v655_v55  ;;  %v668_v61 = vand.u32 2147483648, %v655_v55  ;;  %vm662_vm12 = vweird.f32 %v655_v55  ;;  %v666_v62 = vand.u32 2147483647, %v655_v55 }
 0x9e7   :  { %v669_v16 = vor.u32 1.1754944e-38, %v668_v61  ;;  %vm667_vm14 = vcmp.eq.f32.partialorder %v666_v62, 8.507059e+37 }
 0x9eb   :  { %v1085_v56 = vpop.eup %1084 }
 0x9ec   :  { %v658_v57 = vmul.f32 %v1085_v56, %v655_v55  ;;  %vm663_vm11 = vweird.f32 %v1085_v56 }
 0x9ed   :  { %vm664_vm13 = vmor %vm662_vm12, %vm663_vm11 }
 0x9ee   :  { %v659_v58 = vsub.f32 1.0, %v658_v57 }
 0x9f0   :  { %v660_v59 = vmul.f32 %v1085_v56, %v659_v58 }
 0x9f2   :  { %v661_v60 = vadd.f32 %v1085_v56, %v660_v59 }
 0x9f4   :  { %v665_v63 = vsel %vm664_vm13, %v1085_v56, %v661_v60 }
 0x9f5   :  { %v670_v18 = vsel %vm667_vm14, %v669_v16, %v665_v63  ;;  %v811_v16 = vld [vmem:[#allocation2 + $0x78] sm:$0xff] }
 0x9f6   :  { %v688_v20 = vmul.f32 %v670_v18, %v594_v1 }
 0xa53   :  { %v691_v17 = vpop.permute.xlu0 %690 }
 0xa54   :  { %v693_v19 = vmul.f32 %v691_v17, %v670_v18 }
 0xa56   :  { %695 = vrot.lane.b32.xlu1 %v693_v19, %s1230_s0 }
 0xac8   :  { %v696_v21 = vpop.permute.xlu1 %695 }
 0xac9   :  { %v698_v22 = vadd.f32 %v696_v21, %v688_v20  ;;  %v810_v20 = vld [vmem:[#allocation2 + $0x70] sm:$0xff] }
 0xacb   :  { %1086 = vtanh.f32 %v698_v22 }
 0xacc   :  { %1088 = vpow2.f32 %v999_v24 }
 0xad1   :  { %v1087_v23 = vpop.eup %1086 }
 0xad2   :  { %701 = vrot.lane.b32.xlu2 %v1087_v23, %s1230_s0  ;;  %v1089_v25 = vpop.eup %1088 }
 0xad3   :  { %v656_v26 = vadd.f32 1.0, %v1089_v25 }
 0xad5   :  { %1090 = vrcp.f32 %v656_v26  ;;  %v683_v32 = vand.u32 2147483648, %v656_v26  ;;  %vm677_vm0 = vweird.f32 %v656_v26  ;;  %v681_v33 = vand.u32 2147483647, %v656_v26 }
 0xad7   :  { %v684_v36 = vor.u32 1.1754944e-38, %v683_v32  ;;  %vm682_vm2 = vcmp.eq.f32.partialorder %v681_v33, 8.507059e+37 }
 0xadb   :  { %v1091_v27 = vpop.eup %1090 }
 0xadc   :  { %v673_v28 = vmul.f32 %v1091_v27, %v656_v26  ;;  %vm678_vm15 = vweird.f32 %v1091_v27 }
 0xadd   :  { %vm679_vm1 = vmor %vm677_vm0, %vm678_vm15 }
 0xade   :  { %v674_v29 = vsub.f32 1.0, %v673_v28 }
 0xae0   :  { %v675_v30 = vmul.f32 %v1091_v27, %v674_v29 }
 0xae2   :  { %v676_v31 = vadd.f32 %v1091_v27, %v675_v30 }
 0xae4   :  { %v680_v35 = vsel %vm679_vm1, %v1091_v27, %v676_v31 }
 0xae5   :  { %v685_v37 = vsel %vm682_vm2, %v684_v36, %v680_v35 }
 0xb2c   :  { %v702_v34 = vpop.permute.xlu2 %701 }
 0xb2d   :  { %v704_v38 = vmul.f32 %v702_v34, %v685_v37 }
 0xb2f   :  { %1000 = vmatmul.msk.f32.vlgmr.msrb.gmra.mxu0 %vm83_vm8, %v704_v38  ;;  %1001 = vmatmul.msk.f32.vlgmr.msrb.gmra.mxu1 %vm83_vm8, %v704_v38  ;;  %v920_v38 = vld [vmem:[#allocation7 + $0x38] sm:$0xff] }
 0xb30   :  { %936 = vmatpush.msra.mxu0 %v920_v38 }
 0xbac   :  { %v748_v40 = vpop.f32.mrf.mxu1  ;;  %v728_v0 = vpop.f32.mrf.mxu0 }
 0xbad   :  { %v752_v42 = vadd.f32 %v748_v40, %v707_v39  ;;  %v751_v1 = vadd.f32 %v728_v0, %v706_v44  ;;  %v919_v39 = vld [vmem:[#allocation7 + $0x30] sm:$0xff]  ;;  %v918_v40 = vld [vmem:[#allocation7 + $0x28] sm:$0xff] }
 0xbae   :  { %937 = vmatpush.msra.mxu0 %v919_v39  ;;  %v915_v44 = vld [vmem:[#allocation7 + $0x10] sm:$0xff]  ;;  %v914_v0 = vld [vmem:[#allocation7 + $0x8] sm:$0xff] }
 0xbaf   :  { %1092 = vtanh.f32 %v752_v42  ;;  %v1002_v2 = vmul.f32 -1.442695, %v751_v1  ;;  %v1003_v49 = vmul.f32 -1.442695, %v752_v42  ;;  %v917_v42 = vld [vmem:[#allocation7 + $0x20] sm:$0xff] }
 0xbb0   :  { %938 = vmatpush.msra.mxu0 %v918_v40 }
 0xbb1   :  { %1094 = vpow2.f32 %v1002_v2 }
 0xbb2   :  { %939 = vmatpush.msra.mxu0 %v917_v42 }
 0xbb5   :  { %v1093_v43 = vpop.eup %1092 }
 0xbb6   :  { %794 = vrot.lane.b32.xlu0 %v1093_v43, %s1230_s0  ;;  %v916_v43 = vld [vmem:[#allocation7 + $0x18] sm:$0xff] }
 0xbb7   :  { %v1095_v3 = vpop.eup %1094  ;;  %940 = vmatpush.msra.mxu0 %v916_v43 }
 0xbb8   :  { %v759_v4 = vadd.f32 1.0, %v1095_v3 }
 0xbb9   :  { %941 = vmatpush.msra.mxu0 %v915_v44 }
 0xbba   :  { %1096 = vrcp.f32 %v759_v4  ;;  %v772_v10 = vand.u32 2147483648, %v759_v4  ;;  %vm766_vm4 = vweird.f32 %v759_v4  ;;  %v770_v11 = vand.u32 2147483647, %v759_v4 }
 0xbbb   :  { %942 = vmatpush.msra.mxu0 %v914_v0 }
 0xbbc   :  { %v773_v14 = vor.u32 1.1754944e-38, %v772_v10  ;;  %vm771_vm6 = vcmp.eq.f32.partialorder %v770_v11, 8.507059e+37 }
 0xbc0   :  { %v1097_v5 = vpop.eup %1096 }
 0xbc1   :  { %v762_v6 = vmul.f32 %v1097_v5, %v759_v4  ;;  %vm767_vm3 = vweird.f32 %v1097_v5 }
 0xbc2   :  { %vm768_vm5 = vmor %vm766_vm4, %vm767_vm3 }
 0xbc3   :  { %v763_v7 = vsub.f32 1.0, %v762_v6 }
 0xbc5   :  { %v764_v8 = vmul.f32 %v1097_v5, %v763_v7 }
 0xbc7   :  { %v765_v9 = vadd.f32 %v1097_v5, %v764_v8  ;;  %v913_v8 = vld [vmem:[#allocation7] sm:$0xff] }
 0xbc8   :  { %943 = vmatpush.msra.mxu0 %v913_v8 }
 0xbc9   :  { %v769_v12 = vsel %vm768_vm5, %v1097_v5, %v765_v9 }
 0xbca   :  { %v774_v15 = vsel %vm771_vm6, %v773_v14, %v769_v12 }
 0xbcb   :  { %v792_v45 = vmul.f32 %v774_v15, %v698_v22 }
 0xc28   :  { %v795_v13 = vpop.permute.xlu0 %794 }
 0xc29   :  { %v797_v41 = vmul.f32 %v795_v13, %v774_v15 }
 0xc2b   :  { %799 = vrot.lane.b32.xlu1 %v797_v41, %s1230_s0 }
 0xc9d   :  { %v800_v46 = vpop.permute.xlu1 %799 }
 0xc9e   :  { %v1470_v47 = vadd.f32 %v800_v46, %v792_v45 }
 0xca0   :  { %1098 = vtanh.f32 %v1470_v47 }
 0xca1   :  { %1100 = vpow2.f32 %v1003_v49  ;;  %v1019_v49 = vld [vmem:[%s1490_s3] ss:$0 sm:$0xff] }
 0xca6   :  { %v1099_v48 = vpop.eup %1098 }
 0xca7   :  { %805 = vrot.lane.b32.xlu2 %v1099_v48, %s1230_s0  ;;  %v1101_v50 = vpop.eup %1100 }
 0xca8   :  { %v760_v51 = vadd.f32 1.0, %v1101_v50 }
 0xcaa   :  { %1102 = vrcp.f32 %v760_v51  ;;  %v787_v57 = vand.u32 2147483648, %v760_v51  ;;  %vm781_vm9 = vweird.f32 %v760_v51  ;;  %v785_v58 = vand.u32 2147483647, %v760_v51 }
 0xcac   :  { %v788_v60 = vor.u32 1.1754944e-38, %v787_v57  ;;  %vm786_vm11 = vcmp.eq.f32.partialorder %v785_v58, 8.507059e+37 }
 0xcb0   :  { %v1103_v52 = vpop.eup %1102 }
 0xcb1   :  { %v777_v53 = vmul.f32 %v1103_v52, %v760_v51  ;;  %vm782_vm7 = vweird.f32 %v1103_v52 }
 0xcb2   :  { %vm783_vm10 = vmor %vm781_vm9, %vm782_vm7 }
 0xcb3   :  { %v778_v54 = vsub.f32 1.0, %v777_v53 }
 0xcb5   :  { %v779_v55 = vmul.f32 %v1103_v52, %v778_v54 }
 0xcb7   :  { %v780_v56 = vadd.f32 %v1103_v52, %v779_v55 }
 0xcb9   :  { %v784_v59 = vsel %vm783_vm10, %v1103_v52, %v780_v56 }
 0xcba   :  { %v789_v61 = vsel %vm786_vm11, %v788_v60, %v784_v59 }
 0xd01   :  { %v806_v62 = vpop.permute.xlu2 %805 }
 0xd02   :  { %v808_v63 = vmul.f32 %v806_v62, %v789_v61 }
 0xd04   :  { %1004 = vmatmul.msk.f32.vlgmr.msrb.gmra.mxu2 %vm83_vm8, %v808_v63  ;;  %1005 = vmatmul.msk.f32.vlgmr.msrb.gmra.mxu3 %vm83_vm8, %v808_v63 }
 0xd87   :  { %v852_v17 = vpop.f32.mrf.mxu3  ;;  %v832_v21 = vpop.f32.mrf.mxu2 }
 0xd88   :  { %v856_v18 = vadd.f32 %v852_v17, %v811_v16  ;;  %v855_v22 = vadd.f32 %v832_v21, %v810_v20 }
 0xd8a   :  { %1104 = vtanh.f32 %v856_v18  ;;  %v1006_v23 = vmul.f32 -1.442695, %v855_v22  ;;  %v1007_v5 = vmul.f32 -1.442695, %v856_v18 }
 0xd8c   :  { %1106 = vpow2.f32 %v1006_v23 }
 0xd90   :  { %v1105_v19 = vpop.eup %1104 }
 0xd91   :  { %898 = vrot.lane.b32.xlu0 %v1105_v19, %s1230_s0 }
 0xd92   :  { %v1107_v24 = vpop.eup %1106 }
 0xd93   :  { %v863_v25 = vadd.f32 1.0, %v1107_v24 }
 0xd95   :  { %1108 = vrcp.f32 %v863_v25  ;;  %v876_v31 = vand.u32 2147483648, %v863_v25  ;;  %vm870_vm13 = vweird.f32 %v863_v25  ;;  %v874_v32 = vand.u32 2147483647, %v863_v25 }
 0xd97   :  { %v877_v35 = vor.u32 1.1754944e-38, %v876_v31  ;;  %vm875_vm15 = vcmp.eq.f32.partialorder %v874_v32, 8.507059e+37 }
 0xd9b   :  { %v1109_v26 = vpop.eup %1108 }
 0xd9c   :  { %v866_v27 = vmul.f32 %v1109_v26, %v863_v25  ;;  %vm871_vm12 = vweird.f32 %v1109_v26 }
 0xd9d   :  { %vm872_vm14 = vmor %vm870_vm13, %vm871_vm12 }
 0xd9e   :  { %v867_v28 = vsub.f32 1.0, %v866_v27 }
 0xda0   :  { %v868_v29 = vmul.f32 %v1109_v26, %v867_v28 }
 0xda2   :  { %v869_v30 = vadd.f32 %v1109_v26, %v868_v29 }
 0xda4   :  { %v873_v33 = vsel %vm872_vm14, %v1109_v26, %v869_v30 }
 0xda5   :  { %v878_v37 = vsel %vm875_vm15, %v877_v35, %v873_v33 }
 0xda6   :  { %v896_v1 = vmul.f32 %v878_v37, %v1470_v47 }
 0xe03   :  { %v899_v36 = vpop.permute.xlu0 %898 }
 0xe04   :  { %v901_v34 = vmul.f32 %v899_v36, %v878_v37 }
 0xe06   :  { %903 = vrot.lane.b32.xlu1 %v901_v34, %s1230_s0 }
 0xe78   :  { %v904_v2 = vpop.permute.xlu1 %903 }
 0xe79   :  { %v906_v3 = vadd.f32 %v904_v2, %v896_v1 }
 0xe7b   :  { %1110 = vtanh.f32 %v906_v3 }
 0xe7c   :  { %1112 = vpow2.f32 %v1007_v5 }
 0xe81   :  { %v1111_v4 = vpop.eup %1110 }
 0xe82   :  { %909 = vrot.lane.b32.xlu2 %v1111_v4, %s1230_s0  ;;  %v1113_v6 = vpop.eup %1112 }
 0xe83   :  { %v864_v7 = vadd.f32 1.0, %v1113_v6 }
 0xe85   :  { %1114 = vrcp.f32 %v864_v7  ;;  %v891_v13 = vand.u32 2147483648, %v864_v7  ;;  %vm885_vm1 = vweird.f32 %v864_v7  ;;  %v889_v15 = vand.u32 2147483647, %v864_v7 }
 0xe87   :  { %v892_v45 = vor.u32 1.1754944e-38, %v891_v13  ;;  %vm890_vm3 = vcmp.eq.f32.partialorder %v889_v15, 8.507059e+37 }
 0xe8b   :  { %v1115_v9 = vpop.eup %1114 }
 0xe8c   :  { %v881_v10 = vmul.f32 %v1115_v9, %v864_v7  ;;  %vm886_vm0 = vweird.f32 %v1115_v9 }
 0xe8d   :  { %vm887_vm2 = vmor %vm885_vm1, %vm886_vm0 }
 0xe8e   :  { %v882_v11 = vsub.f32 1.0, %v881_v10 }
 0xe90   :  { %v883_v12 = vmul.f32 %v1115_v9, %v882_v11 }
 0xe92   :  { %v884_v14 = vadd.f32 %v1115_v9, %v883_v12 }
 0xe94   :  { %v888_v41 = vsel %vm887_vm2, %v1115_v9, %v884_v14 }
 0xe95   :  { %v893_v46 = vsel %vm890_vm3, %v892_v45, %v888_v41 }
 0xedc   :  { %v910_v47 = vpop.permute.xlu2 %909 }
 0xedd   :  { %v912_v48 = vmul.f32 %v910_v47, %v893_v46 }
 0xedf   :  { %1008 = vmatmul.msk.f32.vlgmr.msra.gmra.mxu0 %vm83_vm8, %v912_v48 }
 0xf5c   :  { %v945_v50 = vpop.f32.mrf.mxu0 }
 0xf5d   :  { %v946_v51 = vadd.f32 %v1019_v49, %v945_v50 }
 0xf5f   :  { %948 = vmax.xlane.f32.xlu0 %v946_v51 }
 0xfd2   :  { %v949_v52 = vpop.xlane.xlu0 %948 }
 0xfd3   :  { %v950_v53 = vsub.f32 %v946_v51, %v949_v52 }
 0xfd5   :  { %v951_v54 = vmul.f32 1.442695, %v950_v53 }
 0xfd7   :  { %1116 = vpow2.f32 %v951_v54 }
 0xfdd   :  { %v1117_v55 = vpop.eup %1116 }
 0xfde   :  { %953 = vadd.xlane.f32.xlu1 %v1117_v55 }
0x1051   :  { %v954_v56 = vpop.xlane.xlu1 %953 }
0x1052   :  { %1118 = vlog2.f32 %v954_v56 }
0x1058   :  { %v1119_v57 = vpop.eup %1118 }
0x1059   :  { %v956_v58 = vmul.f32 0.6931472, %v1119_v57 }
0x105b   :  { %v957_v59 = vadd.f32 %v956_v58, %v949_v52 }
0x105d   :  { %v958_v60 = vsub.f32 %v946_v51, %v957_v59 }
0x105f   :  { %959 = vst [vmem:[#allocation8] sm:$0xff] %v958_v60 }
0x1060   :  { %970 = dma.vmem_to_hbm [thread:$0]  %s966_s9, 128, %s968_s12, [#allocation4]  }
0x1061   :  { %1220 = dma.done.wait [#allocation4], 128  }
0x1062   :  { %1221 = vsyncadd [#allocation4], 4294967168 }
0x1063   :  { %975 = vsyncpa [#allocation3], 1 }
0x1064   :  { %976 = vsyncpa [#allocation6], 1 }
0x1065   :  { %977 = vsyncpa [#allocation4], 1 }

</bundles_post_ra>
